<compile_context>
chip_gen: v7x
topology: tpu7x:2x2x1
jax: 0.10.0
libtpu: 0.0.40
codegen_flags: <defaults>
</compile_context>

<pallas_src>
import functools

import jax
import jax.numpy as jnp
from jax.experimental import pallas as pl
from jax.experimental.pallas import tpu as pltpu

_EPS = 1e-5  # PyTorch default eps (InstanceNorm2d / BatchNorm2d)


def _round_up(x, m):
    return int(pl.cdiv(int(x), m)) * m


@functools.lru_cache(maxsize=None)
def _vmem_limit_bytes():
    """Generation-aware scoped-VMEM ceiling (v5e/v6e: 128 MiB, v7x: 64 MiB)."""
    try:
        cap = int(pltpu.get_tpu_info().vmem_capacity_bytes)
    except Exception:
        cap = 64 * 1024 * 1024  # conservative fallback (v7x-sized part)
    return int(min(96 * 1024 * 1024, (cap * 3) // 4))


def _pick_tile(hw, C, itemsize, vmem_limit):
    """Bandwidth/VMEM-budget-driven spatial tile (multiple of 128 lanes)."""
    hw128 = _round_up(hw, 128)
    # Worst-case per-step VMEM (stage 1): ~5 streamed [C, tile] slabs (corr,
    # coh, feats in + x out + slack), double-buffered, plus ~4 f32 temporaries.
    per_lane = C * (2 * 5 * itemsize + 4 * 4)
    tile_cap = max(128, ((int(0.4 * vmem_limit) // per_lane) // 128) * 128)
    # Bandwidth target: >= ~1 MiB per streamed slab keeps the DMA near roofline.
    tile_bw = _round_up(max(1, (1 << 20) // (C * itemsize)), 128)
    return int(max(128, min(tile_cap, max(tile_bw, 512), hw128)))


# ---------------------------------------------------------------------------
# Tiled (HBM-streaming) kernels. Activation layout: [B, C, HW_pad];
# grid = (B, HW_pad // tile). Each step sees a lane-dense [C, tile] slab.
# ---------------------------------------------------------------------------
def _accum_channel_stats(sum_ref, sq_ref, vals, t):
    """Per-(b,c) sum / sum-of-squares over the spatial (lane) axis.  No mask:
    stage-1 padded lanes are exactly zero; the stage-2 pad contribution is
    removed analytically host-side."""
    @pl.when(t == 0)
    def _():
        sum_ref[...] = jnp.zeros_like(sum_ref)
        sq_ref[...] = jnp.zeros_like(sq_ref)

    sum_ref[0] += jnp.sum(vals, axis=-1, keepdims=True)        # [C, 1]
    sq_ref[0] += jnp.sum(vals * vals, axis=-1, keepdims=True)  # [C, 1]


def _gate_residual_kernel(corr_ref, coh_ref, feats_ref, wc_ref, wh_ref, fb_ref,
                          x_ref, sum_ref, sq_ref):
    """x = corr - sigmoid(fc([corr; coh])) * feats, plus per-(b,c) moments."""
    t = pl.program_id(1)
    corr = corr_ref[0].astype(jnp.float32)                      # [C, T]
    coh = coh_ref[0].astype(jnp.float32)                        # [C, T]
    logits = (jnp.dot(wc_ref[...], corr, preferred_element_type=jnp.float32)
              + jnp.dot(wh_ref[...], coh, preferred_element_type=jnp.float32)
              + fb_ref[0, 0])                                   # [1, T]
    x = corr - jax.nn.sigmoid(logits) * feats_ref[0].astype(jnp.float32)
    x_ref[0] = x.astype(x_ref.dtype)
    _accum_channel_stats(sum_ref, sq_ref, x, t)


def _plain_residual_kernel(corr_ref, feats_ref, x_ref, sum_ref, sq_ref):
    """pre_defined_alpha branch: x = corr - feats (alpha unused in the module)."""
    t = pl.program_id(1)
    x = corr_ref[0].astype(jnp.float32) - feats_ref[0].astype(jnp.float32)
    x_ref[0] = x.astype(x_ref.dtype)
    _accum_channel_stats(sum_ref, sq_ref, x, t)


def _norm_relu_conv_stats_kernel(x_ref, scale_ref, shift_ref, w_ref, b_ref,
                                 y_ref, sum_ref, sq_ref, *, mxu_dtype):
    """y = W @ relu(x*scale + shift) + b, plus per-(b,c) moments of y."""
    t = pl.program_id(1)
    x = x_ref[0].astype(jnp.float32)                            # [C, T]
    h = jnp.maximum(x * scale_ref[0] + shift_ref[0], 0.0)       # fused IN+BN+ReLU
    y = jnp.dot(w_ref[...], h.astype(mxu_dtype),
                preferred_element_type=jnp.float32) + b_ref[...]
    y_ref[0] = y.astype(y_ref.dtype)
    _accum_channel_stats(sum_ref, sq_ref, y, t)


def _norm_relu_conv_kernel(x_ref, scale_ref, shift_ref, w_ref, b_ref, y_ref,
                           *, mxu_dtype):
    """Final stage: y = W @ relu(x*scale + shift) + b (no stats)."""
    x = x_ref[0].astype(jnp.float32)
    h = jnp.maximum(x * scale_ref[0] + shift_ref[0], 0.0)
    y_ref[0] = (jnp.dot(w_ref[...], h.astype(mxu_dtype),
                        preferred_element_type=jnp.float32)
                + b_ref[...]).astype(y_ref.dtype)


# ---------------------------------------------------------------------------
# Fully-VMEM-resident fused kernel for small feature maps (single pallas_call,
# no grid: x / h1 never touch HBM, no host sync for the statistics).
# ---------------------------------------------------------------------------
def _fused_small_kernel(*refs, B, hw, hw_pad, gated, mxu_dtype):
    if gated:
        (corr_ref, coh_ref, feats_ref, wc_ref, wh_ref, fb_ref,
         g1_ref, be1_ref, w1_ref, b1_ref, g2_ref, be2_ref, w2_ref, b2_ref,
         out_ref) = refs
    else:
        (corr_ref, feats_ref,
         g1_ref, be1_ref, w1_ref, b1_ref, g2_ref, be2_ref, w2_ref, b2_ref,
         out_ref) = refs

    inv_hw = 1.0 / hw
    need_mask = hw_pad != hw
    if need_mask:
        lane = jax.lax.broadcasted_iota(jnp.int32, (1, hw_pad), 1)
        valid = lane < hw

    # IN (biased, no affine) -> BN (train, biased, affine) folded to per-(b,c)
    # scale/shift.  Valid because IN output has zero mean per (b,c) and every
    # sample shares the same spatial size, so BN mean = 0 and
    # BN var_c = mean_b[v_bc / (v_bc + eps)].
    def fused_affine(ms, vs, gamma, beta):
        v_bn = sum(v / (v + _EPS) for v in vs) * (1.0 / B)      # (C, 1)
        inv_bn = jax.lax.rsqrt(v_bn + _EPS)
        out = []
        for m, v in zip(ms, vs):
            sc = jax.lax.rsqrt(v + _EPS) * inv_bn * gamma
            out.append((sc, beta - m * sc))
        return out

    # ---- stage 1: residual + per-(b,c) moments (padded lanes are exactly 0) --
    xs, m1, v1 = [], [], []
    for b in range(B):
        corr = corr_ref[b].astype(jnp.float32)                  # (C, P)
        feats = feats_ref[b].astype(jnp.float32)
        if gated:
            coh = coh_ref[b].astype(jnp.float32)
            logits = (jnp.dot(wc_ref[...], corr, preferred_element_type=jnp.float32)
                      + jnp.dot(wh_ref[...], coh, preferred_element_type=jnp.float32)
                      + fb_ref[0, 0])
            x = corr - jax.nn.sigmoid(logits) * feats
        else:
            x = corr - feats
        xs.append(x)
        m = jnp.sum(x, axis=-1, keepdims=True) * inv_hw
        v = jnp.maximum(jnp.sum(x * x, axis=-1, keepdims=True) * inv_hw - m * m, 0.0)
        m1.append(m)
        v1.append(v)

    aff1 = fused_affine(m1, v1, g1_ref[...], be1_ref[...])

    # ---- stage 2: fused IN+BN+ReLU -> conv1, masked moments of its output ----
    ys, m2, v2 = [], [], []
    for b in range(B):
        sc, sh = aff1[b]
        h = jnp.maximum(xs[b] * sc + sh, 0.0)
        y = jnp.dot(w1_ref[...], h.astype(mxu_dtype),
                    preferred_element_type=jnp.float32) + b1_ref[...]
        ys.append(y)
        ym = jnp.where(valid, y, 0.0) if need_mask else y
        m = jnp.sum(ym, axis=-1, keepdims=True) * inv_hw
        v = jnp.maximum(jnp.sum(ym * ym, axis=-1, keepdims=True) * inv_hw - m * m, 0.0)
        m2.append(m)
        v2.append(v)

    aff2 = fused_affine(m2, v2, g2_ref[...], be2_ref[...])

    # ---- stage 3: fused IN+BN+ReLU -> conv2 -----------------------------------
    for b in range(B):
        sc, sh = aff2[b]
        h = jnp.maximum(ys[b] * sc + sh, 0.0)
        out_ref[b] = (jnp.dot(w2_ref[...], h.astype(mxu_dtype),
                              preferred_element_type=jnp.float32)
                      + b2_ref[...]).astype(out_ref.dtype)


# ---------------------------------------------------------------------------
# Host-side (tiny, [B, C]-sized) helpers.
# ---------------------------------------------------------------------------
def _fused_in_bn_affine(s, q, gamma, beta, hw):
    """Fold IN(biased, no affine) -> BN(train, biased, affine) into per-(b,c)
    scale/shift.  Requires all samples to share the same spatial size and both
    norms to use biased variance (true for this module)."""
    # NOTE: single-pass variance (q/hw - m^2) in f32; fine at these scales,
    # clamped at 0 to guard against cancellation.
    m = s / hw                                            # (B, C, 1)
    v = jnp.maximum(q / hw - m * m, 0.0)
    inv_in = jax.lax.rsqrt(v + _EPS)
    v_bn = jnp.mean(v / (v + _EPS), axis=0, keepdims=True)  # (1, C, 1)
    inv_bn = jax.lax.rsqrt(v_bn + _EPS)
    scale = inv_in * inv_bn * gamma[None]                 # (B, C, 1)
    shift = beta[None] - m * scale
    return scale.astype(jnp.float32), shift.astype(jnp.float32)


def _pad_stats_correction(shift1, w1, b1, n_pad, mxu_dtype):
    """Padded lanes of x are exactly zero, so conv1 writes
    y_pad = W1 @ relu(shift1) + b1 there; subtract that analytically from the
    stage-2 moments instead of masking every [C, tile] slab in-kernel."""
    h_pad = jnp.maximum(shift1, 0.0).astype(mxu_dtype)    # (B, C, 1)
    y_pad = jnp.einsum("oc,bcx->box", w1, h_pad,
                       preferred_element_type=jnp.float32) + b1[None]
    return n_pad * y_pad, n_pad * y_pad * y_pad


# ---------------------------------------------------------------------------
# Forward wrapper.
# ---------------------------------------------------------------------------
def afam_forward(corr, coh, feats, params, pre_defined_alpha=None, *,
                 storage_dtype=jnp.float32, mxu_dtype=jnp.bfloat16,
                 force_tiled=False):
    """corr / coh / feats: NCHW. Returns NCHW float32."""
    B, C, H, W = corr.shape
    hw = H * W
    gated = pre_defined_alpha is None
    vmem_limit = _vmem_limit_bytes()
    hw128 = _round_up(hw, 128)

    w1 = params["conv1_w"].astype(mxu_dtype)
    w2 = params["conv2_w"].astype(mxu_dtype)
    b1, b2 = params["conv1_b"], params["conv2_b"]

    # ---------------- fully-VMEM-resident fast path (small feature maps) ------
    fused_bytes = 12 * B * C * hw128 * 4 + 4 * C * C * 4
    if (not force_tiled) and fused_bytes <= vmem_limit // 2 and B <= 16:
        hw_pad = hw128

        def prep(a):
            a = a.reshape(B, C, hw)
            if hw_pad != hw:
                a = jnp.pad(a, ((0, 0), (0, 0), (0, hw_pad - hw)))
            return a

        vspec = pl.BlockSpec(memory_space=pltpu.MemorySpace.VMEM)
        sspec = pl.BlockSpec(memory_space=pltpu.MemorySpace.SMEM)
        common_args = [params["bn1_gamma"], params["bn1_beta"], w1, b1,
                       params["bn2_gamma"], params["bn2_beta"], w2, b2]
        if gated:
            args = [prep(corr), prep(coh), prep(feats),
                    params["fc_w_corr"], params["fc_w_coh"], params["fc_b"]]
            in_specs = [vspec, vspec, vspec, vspec, vspec, sspec] + [vspec] * 8
        else:
            args = [prep(corr), prep(feats)]
            in_specs = [vspec, vspec] + [vspec] * 8
        args += common_args

        out_pad = pl.pallas_call(
            functools.partial(_fused_small_kernel, B=B, hw=hw, hw_pad=hw_pad,
                              gated=gated, mxu_dtype=mxu_dtype),
            out_shape=jax.ShapeDtypeStruct((B, C, hw_pad), jnp.float32),
            in_specs=in_specs,
            out_specs=vspec,
            compiler_params=pltpu.CompilerParams(vmem_limit_bytes=vmem_limit),
            cost_estimate=pl.CostEstimate(
                flops=int((4 * C * C + 16 * C) * B * hw_pad),
                transcendentals=int(B * hw_pad) if gated else 0,
                bytes_accessed=int((5 if gated else 4) * B * C * hw_pad * 4)),
        )(*args)
        out = out_pad[:, :, :hw] if hw_pad != hw else out_pad
        return out.reshape(B, C, H, W)

    # ---------------- streamed 3-stage pipeline (large feature maps) ----------
    itemsize = jnp.dtype(storage_dtype).itemsize
    tile = _pick_tile(hw, C, itemsize, vmem_limit)
    hw_pad = _round_up(hw, tile)          # multiple of tile -> all blocks in-bounds
    n_t = hw_pad // tile
    n_pad = hw_pad - hw
    grid = (B, n_t)

    def prep(a):
        a = a.reshape(B, C, hw).astype(storage_dtype)
        if n_pad:
            a = jnp.pad(a, ((0, 0), (0, 0), (0, n_pad)))   # zeros keep stats exact
        return a

    corr3, feats3 = prep(corr), prep(feats)

    act_spec = pl.BlockSpec((1, C, tile), lambda b, t: (b, 0, t))   # streamed slabs
    vec_spec = pl.BlockSpec((1, C, 1), lambda b, t: (b, 0, 0))      # per-(b,c) vectors
    wrow_spec = pl.BlockSpec((1, C), lambda b, t: (0, 0))           # fc weight rows
    wmat_spec = pl.BlockSpec((C, C), lambda b, t: (0, 0))           # conv weights
    bias_spec = pl.BlockSpec((C, 1), lambda b, t: (0, 0))           # conv bias
    smem_spec = pl.BlockSpec(memory_space=pltpu.MemorySpace.SMEM)   # fc bias scalar

    stats_shape = jax.ShapeDtypeStruct((B, C, 1), jnp.float32)
    act_shape = jax.ShapeDtypeStruct((B, C, hw_pad), storage_dtype)
    act_bytes = B * C * hw_pad * itemsize

    # Spatial axis carries resident stat accumulators -> "arbitrary"; batch is
    # independent -> "parallel" (shards across the 2 TCs on v7x).
    # TODO(synk): v7x with B==1 leaves one TensorCore idle on the stats stages;
    # a spatial "parallel" split with partial stats is not implemented.
    reduce_params = pltpu.CompilerParams(
        dimension_semantics=("parallel", "arbitrary"),
        vmem_limit_bytes=vmem_limit)
    parallel_params = pltpu.CompilerParams(
        dimension_semantics=("parallel", "parallel"),
        vmem_limit_bytes=vmem_limit)

    # ---- stage 1: (gated) residual + first/second moments of it -------------
    if gated:
        x, s1, q1 = pl.pallas_call(
            _gate_residual_kernel, grid=grid,
            in_specs=[act_spec, act_spec, act_spec, wrow_spec, wrow_spec, smem_spec],
            out_specs=(act_spec, vec_spec, vec_spec),
            out_shape=(act_shape, stats_shape, stats_shape),
            compiler_params=reduce_params,
            cost_estimate=pl.CostEstimate(
                flops=int(10 * C * B * hw_pad), transcendentals=int(B * hw_pad),
                bytes_accessed=int(4 * act_bytes)),
        )(corr3, prep(coh), feats3, params["fc_w_corr"], params["fc_w_coh"],
          params["fc_b"])
    else:
        x, s1, q1 = pl.pallas_call(
            _plain_residual_kernel, grid=grid,
            in_specs=[act_spec, act_spec],
            out_specs=(act_spec, vec_spec, vec_spec),
            out_shape=(act_shape, stats_shape, stats_shape),
            compiler_params=reduce_params,
            cost_estimate=pl.CostEstimate(
                flops=int(5 * C * B * hw_pad), transcendentals=0,
                bytes_accessed=int(3 * act_bytes)),
        )(corr3, feats3)

    scale1, shift1 = _fused_in_bn_affine(s1, q1, params["bn1_gamma"],
                                         params["bn1_beta"], hw)

    # ---- stage 2: fused IN+BN+ReLU -> conv1, + moments of conv1 output ------
    h1, s2, q2 = pl.pallas_call(
        functools.partial(_norm_relu_conv_stats_kernel, mxu_dtype=mxu_dtype),
        grid=grid,
        in_specs=[act_spec, vec_spec, vec_spec, wmat_spec, bias_spec],
        out_specs=(act_spec, vec_spec, vec_spec),
        out_shape=(act_shape, stats_shape, stats_shape),
        compiler_params=reduce_params,
        cost_estimate=pl.CostEstimate(
            flops=int((2 * C * C + 8 * C) * B * hw_pad), transcendentals=0,
            bytes_accessed=int(2 * act_bytes)),
    )(x, scale1, shift1, w1, b1)

    if n_pad:
        ds, dq = _pad_stats_correction(shift1, w1, b1, n_pad, mxu_dtype)
        s2, q2 = s2 - ds, q2 - dq

    scale2, shift2 = _fused_in_bn_affine(s2, q2, params["bn2_gamma"],
                                         params["bn2_beta"], hw)

    # ---- stage 3: fused IN+BN+ReLU -> conv2 ----------------------------------
    out = pl.pallas_call(
        functools.partial(_norm_relu_conv_kernel, mxu_dtype=mxu_dtype),
        grid=grid,
        in_specs=[act_spec, vec_spec, vec_spec, wmat_spec, bias_spec],
        out_specs=act_spec,
        out_shape=jax.ShapeDtypeStruct((B, C, hw_pad), jnp.float32),
        compiler_params=parallel_params,
        cost_estimate=pl.CostEstimate(
            flops=int((2 * C * C + 6 * C) * B * hw_pad), transcendentals=0,
            bytes_accessed=int(act_bytes + B * C * hw_pad * 4)),
    )(h1, scale2, shift2, w2, b2)

    if n_pad:
        out = out[:, :, :hw]
    return out.reshape(B, C, H, W)


# ---------------------------------------------------------------------------
# Pure-JAX reference (two-pass norms, matches the PyTorch forward) + params.
# ---------------------------------------------------------------------------
def afam_reference(corr, coh, feats, params, pre_defined_alpha=None):
    B, C, H, W = corr.shape
    x = corr.astype(jnp.float32)
    if pre_defined_alpha is None:
        w = jnp.concatenate([params["fc_w_corr"], params["fc_w_coh"]], axis=1)
        cat = jnp.concatenate([x, coh.astype(jnp.float32)], axis=1)
        logits = jnp.einsum("oc,bchw->bohw", w, cat) + params["fc_b"][0, 0]
        a = x - jax.nn.sigmoid(logits) * feats.astype(jnp.float32)
    else:
        a = x - feats.astype(jnp.float32)

    def inorm(t):
        m = jnp.mean(t, axis=(2, 3), keepdims=True)
        v = jnp.mean((t - m) ** 2, axis=(2, 3), keepdims=True)
        return (t - m) * jax.lax.rsqrt(v + _EPS)

    def bnorm(t, g, b):
        m = jnp.mean(t, axis=(0, 2, 3), keepdims=True)
        v = jnp.mean((t - m) ** 2, axis=(0, 2, 3), keepdims=True)
        return ((t - m) * jax.lax.rsqrt(v + _EPS) * g.reshape(1, C, 1, 1)
                + b.reshape(1, C, 1, 1))

    def conv1x1(t, w, b):
        return jnp.einsum("oc,bchw->bohw", w, t) + b.reshape(1, C, 1, 1)

    h = jnp.maximum(bnorm(inorm(a), params["bn1_gamma"], params["bn1_beta"]), 0.0)
    h = conv1x1(h, params["conv1_w"], params["conv1_b"])
    h = jnp.maximum(bnorm(inorm(h), params["bn2_gamma"], params["bn2_beta"]), 0.0)
    return conv1x1(h, params["conv2_w"], params["conv2_b"])


def init_params(key, C):
    """Deterministic synthetic init (shapes follow the nn.Module __init__)."""
    ks = jax.random.split(key, 6)
    s = 0.1
    return {
        "fc_w_corr": s * jax.random.normal(ks[0], (1, C), jnp.float32),
        "fc_w_coh":  s * jax.random.normal(ks[1], (1, C), jnp.float32),
        "fc_b":      jnp.zeros((1, 1), jnp.float32),
        "bn1_gamma": jnp.ones((C, 1), jnp.float32),
        "bn1_beta":  jnp.zeros((C, 1), jnp.float32),
        "conv1_w":   s * jax.random.normal(ks[2], (C, C), jnp.float32),
        "conv1_b":   s * jax.random.normal(ks[3], (C, 1), jnp.float32),
        "bn2_gamma": jnp.ones((C, 1), jnp.float32),
        "bn2_beta":  jnp.zeros((C, 1), jnp.float32),
        "conv2_w":   s * jax.random.normal(ks[4], (C, C), jnp.float32),
        "conv2_b":   s * jax.random.normal(ks[5], (C, 1), jnp.float32),
    }
    # TODO(synk): BatchNorm running_mean/running_var buffer updates are not
    # emitted (forward-output parity with a fresh training-mode module only).


def _rel_err(a, b):
    return float(jnp.linalg.norm((a - b).astype(jnp.float32))
                 / (jnp.linalg.norm(b.astype(jnp.float32)) + 1e-12))


if __name__ == "__main__":
    key = jax.random.PRNGKey(0)
    B, C, H, W = 2, 32, 16, 16
    kc, kh, kf, kp, kq = jax.random.split(key, 5)
    corr = jax.random.normal(kc, (B, C, H, W), jnp.float32)
    coh = jax.random.normal(kh, (B, C, H, W), jnp.float32)
    feats = jax.random.normal(kf, (B, C, H, W), jnp.float32)
    params = init_params(kp, C)

    ref = afam_reference(corr, coh, feats, params, pre_defined_alpha=None)

    # Small feature map -> fully-VMEM-resident fused path; f32 MXU, strict check.
    out_f32 = afam_forward(corr, coh, feats, params, mxu_dtype=jnp.float32)
    jax.block_until_ready(out_f32)
    assert out_f32.shape == (B, C, H, W) and out_f32.dtype == jnp.float32
    assert bool(jnp.all(jnp.isfinite(out_f32)))
    assert bool(jnp.allclose(out_f32, ref, atol=5e-3, rtol=5e-3))

    # Default path: bf16 MXU operands with f32 accumulation.
    out_bf = afam_forward(corr, coh, feats, params)
    jax.block_until_ready(out_bf)
    assert _rel_err(out_bf, ref) < 1e-2

    # pre_defined_alpha branch (plain residual), fused path.
    ref2 = afam_reference(corr, coh, feats, params, pre_defined_alpha=1.0)
    out2 = afam_forward(corr, coh, feats, params, pre_defined_alpha=1.0,
                        mxu_dtype=jnp.float32)
    jax.block_until_ready(out2)
    assert bool(jnp.allclose(out2, ref2, atol=5e-3, rtol=5e-3))

    # Streamed 3-stage pipeline (forced), same inputs, strict f32 check.
    out3 = afam_forward(corr, coh, feats, params, force_tiled=True,
                        mxu_dtype=jnp.float32)
    jax.block_until_ready(out3)
    assert bool(jnp.allclose(out3, ref, atol=5e-3, rtol=5e-3))

    # Non-128-multiple spatial size: exercises zero-padding (fused in-kernel
    # mask; tiled analytic stage-2 pad correction).
    ks = jax.random.split(kq, 3)
    Hs, Ws = 14, 14
    corr_s = jax.random.normal(ks[0], (B, C, Hs, Ws), jnp.float32)
    coh_s = jax.random.normal(ks[1], (B, C, Hs, Ws), jnp.float32)
    feats_s = jax.random.normal(ks[2], (B, C, Hs, Ws), jnp.float32)
    ref_s = afam_reference(corr_s, coh_s, feats_s, params, pre_defined_alpha=None)
    out_s_f = afam_forward(corr_s, coh_s, feats_s, params, mxu_dtype=jnp.float32)
    out_s_t = afam_forward(corr_s, coh_s, feats_s, params, mxu_dtype=jnp.float32,
                           force_tiled=True)
    jax.block_until_ready((out_s_f, out_s_t))
    assert bool(jnp.allclose(out_s_f, ref_s, atol=5e-3, rtol=5e-3))
    assert bool(jnp.allclose(out_s_t, ref_s, atol=5e-3, rtol=5e-3))

    # bf16 HBM storage for the inter-stage activations (tiled path).
    out_bf16 = afam_forward(corr, coh, feats, params, force_tiled=True,
                            storage_dtype=jnp.bfloat16)
    jax.block_until_ready(out_bf16)
    assert bool(jnp.all(jnp.isfinite(out_bf16)))
    assert _rel_err(out_bf16, ref) < 3e-2

    print("KERNEL_OK")
</pallas_src>

<mosaic_0001>
module attributes {stable_mosaic.version = 11 : i64} {
  func.func @_fused_small_kernel(%arg0: memref<2x32x256xf32, #tpu.memory_space<vmem>>, %arg1: memref<2x32x256xf32, #tpu.memory_space<vmem>>, %arg2: memref<2x32x256xf32, #tpu.memory_space<vmem>>, %arg3: memref<1x32xf32, #tpu.memory_space<vmem>>, %arg4: memref<1x32xf32, #tpu.memory_space<vmem>>, %arg5: memref<1x1xf32, #tpu.memory_space<smem>>, %arg6: memref<32x1xf32, #tpu.memory_space<vmem>>, %arg7: memref<32x1xf32, #tpu.memory_space<vmem>>, %arg8: memref<32x32xf32, #tpu.memory_space<vmem>>, %arg9: memref<32x1xf32, #tpu.memory_space<vmem>>, %arg10: memref<32x1xf32, #tpu.memory_space<vmem>>, %arg11: memref<32x1xf32, #tpu.memory_space<vmem>>, %arg12: memref<32x32xf32, #tpu.memory_space<vmem>>, %arg13: memref<32x1xf32, #tpu.memory_space<vmem>>, %arg14: memref<2x32x256xf32, #tpu.memory_space<vmem>>) attributes {dimension_semantics = [], scalar_prefetch = 0 : i64, scratch_operands = 0 : i64, tpu.core_type = #tpu.core_type<tc>} {
    %c0 = arith.constant 0 : index
    %c0_0 = arith.constant 0 : index
    %c0_1 = arith.constant 0 : index
    %0 = vector.load %arg0[%c0, %c0_0, %c0_1] : memref<2x32x256xf32, #tpu.memory_space<vmem>>, vector<1x32x256xf32>
    %1 = vector.shape_cast %0 : vector<1x32x256xf32> to vector<32x256xf32>
    %c0_2 = arith.constant 0 : index
    %c0_3 = arith.constant 0 : index
    %c0_4 = arith.constant 0 : index
    %2 = vector.load %arg2[%c0_2, %c0_3, %c0_4] : memref<2x32x256xf32, #tpu.memory_space<vmem>>, vector<1x32x256xf32>
    %3 = vector.shape_cast %2 : vector<1x32x256xf32> to vector<32x256xf32>
    %c0_5 = arith.constant 0 : index
    %c0_6 = arith.constant 0 : index
    %c0_7 = arith.constant 0 : index
    %4 = vector.load %arg1[%c0_5, %c0_6, %c0_7] : memref<2x32x256xf32, #tpu.memory_space<vmem>>, vector<1x32x256xf32>
    %5 = vector.shape_cast %4 : vector<1x32x256xf32> to vector<32x256xf32>
    %c0_8 = arith.constant 0 : index
    %c0_9 = arith.constant 0 : index
    %6 = vector.load %arg3[%c0_8, %c0_9] : memref<1x32xf32, #tpu.memory_space<vmem>>, vector<1x32xf32>
    %cst = arith.constant dense<0.000000e+00> : vector<1x256xf32>
    %7 = tpu.matmul %6, %1, %cst {dimension_numbers = #tpu.dot_dimension_numbers<[1], [0], [0], [1], [0, 0, 1, 1], [], []>} : vector<1x32xf32>, vector<32x256xf32>, vector<1x256xf32> -> vector<1x256xf32>
    %c0_10 = arith.constant 0 : index
    %c0_11 = arith.constant 0 : index
    %8 = vector.load %arg4[%c0_10, %c0_11] : memref<1x32xf32, #tpu.memory_space<vmem>>, vector<1x32xf32>
    %cst_12 = arith.constant dense<0.000000e+00> : vector<1x256xf32>
    %9 = tpu.matmul %8, %5, %cst_12 {dimension_numbers = #tpu.dot_dimension_numbers<[1], [0], [0], [1], [0, 0, 1, 1], [], []>} : vector<1x32xf32>, vector<32x256xf32>, vector<1x256xf32> -> vector<1x256xf32>
    %10 = arith.addf %7, %9 : vector<1x256xf32>
    %c0_13 = arith.constant 0 : index
    %c0_14 = arith.constant 0 : index
    %11 = memref.load %arg5[%c0_13, %c0_14] : memref<1x1xf32, #tpu.memory_space<smem>>
    %12 = vector.broadcast %11 : f32 to vector<1x256xf32>
    %13 = arith.addf %10, %12 : vector<1x256xf32>
    %14 = arith.negf %13 : vector<1x256xf32>
    %15 = math.exp %14 : vector<1x256xf32>
    %cst_15 = arith.constant 1.000000e+00 : f32
    %16 = vector.broadcast %cst_15 : f32 to vector<1x256xf32>
    %17 = arith.addf %16, %15 : vector<1x256xf32>
    %18 = arith.divf %16, %17 : vector<1x256xf32>
    %19 = vector.broadcast %18 : vector<1x256xf32> to vector<32x256xf32>
    %20 = arith.mulf %19, %3 : vector<32x256xf32>
    %21 = arith.subf %1, %20 : vector<32x256xf32>
    %cst_16 = arith.constant dense<0.000000e+00> : vector<32xf32>
    %22 = vector.multi_reduction <add>, %21, %cst_16 [1] : vector<32x256xf32> to vector<32xf32>
    %23 = vector.shape_cast %22 : vector<32xf32> to vector<32x1xf32>
    %cst_17 = arith.constant 3.906250e-03 : f32
    %24 = vector.broadcast %cst_17 : f32 to vector<32x1xf32>
    %25 = arith.mulf %23, %24 : vector<32x1xf32>
    %26 = arith.mulf %21, %21 : vector<32x256xf32>
    %cst_18 = arith.constant dense<0.000000e+00> : vector<32xf32>
    %27 = vector.multi_reduction <add>, %26, %cst_18 [1] : vector<32x256xf32> to vector<32xf32>
    %28 = vector.shape_cast %27 : vector<32xf32> to vector<32x1xf32>
    %cst_19 = arith.constant 3.906250e-03 : f32
    %29 = vector.broadcast %cst_19 : f32 to vector<32x1xf32>
    %30 = arith.mulf %28, %29 : vector<32x1xf32>
    %31 = arith.mulf %25, %25 : vector<32x1xf32>
    %32 = arith.subf %30, %31 : vector<32x1xf32>
    %cst_20 = arith.constant 0.000000e+00 : f32
    %33 = vector.broadcast %cst_20 : f32 to vector<32x1xf32>
    %34 = arith.maximumf %32, %33 : vector<32x1xf32>
    %c1 = arith.constant 1 : index
    %c0_21 = arith.constant 0 : index
    %c0_22 = arith.constant 0 : index
    %35 = vector.load %arg0[%c1, %c0_21, %c0_22] : memref<2x32x256xf32, #tpu.memory_space<vmem>>, vector<1x32x256xf32>
    %36 = vector.shape_cast %35 : vector<1x32x256xf32> to vector<32x256xf32>
    %c1_23 = arith.constant 1 : index
    %c0_24 = arith.constant 0 : index
    %c0_25 = arith.constant 0 : index
    %37 = vector.load %arg2[%c1_23, %c0_24, %c0_25] : memref<2x32x256xf32, #tpu.memory_space<vmem>>, vector<1x32x256xf32>
    %38 = vector.shape_cast %37 : vector<1x32x256xf32> to vector<32x256xf32>
    %c1_26 = arith.constant 1 : index
    %c0_27 = arith.constant 0 : index
    %c0_28 = arith.constant 0 : index
    %39 = vector.load %arg1[%c1_26, %c0_27, %c0_28] : memref<2x32x256xf32, #tpu.memory_space<vmem>>, vector<1x32x256xf32>
    %40 = vector.shape_cast %39 : vector<1x32x256xf32> to vector<32x256xf32>
    %c0_29 = arith.constant 0 : index
    %c0_30 = arith.constant 0 : index
    %41 = vector.load %arg3[%c0_29, %c0_30] : memref<1x32xf32, #tpu.memory_space<vmem>>, vector<1x32xf32>
    %cst_31 = arith.constant dense<0.000000e+00> : vector<1x256xf32>
    %42 = tpu.matmul %41, %36, %cst_31 {dimension_numbers = #tpu.dot_dimension_numbers<[1], [0], [0], [1], [0, 0, 1, 1], [], []>} : vector<1x32xf32>, vector<32x256xf32>, vector<1x256xf32> -> vector<1x256xf32>
    %c0_32 = arith.constant 0 : index
    %c0_33 = arith.constant 0 : index
    %43 = vector.load %arg4[%c0_32, %c0_33] : memref<1x32xf32, #tpu.memory_space<vmem>>, vector<1x32xf32>
    %cst_34 = arith.constant dense<0.000000e+00> : vector<1x256xf32>
    %44 = tpu.matmul %43, %40, %cst_34 {dimension_numbers = #tpu.dot_dimension_numbers<[1], [0], [0], [1], [0, 0, 1, 1], [], []>} : vector<1x32xf32>, vector<32x256xf32>, vector<1x256xf32> -> vector<1x256xf32>
    %45 = arith.addf %42, %44 : vector<1x256xf32>
    %c0_35 = arith.constant 0 : index
    %c0_36 = arith.constant 0 : index
    %46 = memref.load %arg5[%c0_35, %c0_36] : memref<1x1xf32, #tpu.memory_space<smem>>
    %47 = vector.broadcast %46 : f32 to vector<1x256xf32>
    %48 = arith.addf %45, %47 : vector<1x256xf32>
    %49 = arith.negf %48 : vector<1x256xf32>
    %50 = math.exp %49 : vector<1x256xf32>
    %cst_37 = arith.constant 1.000000e+00 : f32
    %51 = vector.broadcast %cst_37 : f32 to vector<1x256xf32>
    %52 = arith.addf %51, %50 : vector<1x256xf32>
    %53 = arith.divf %51, %52 : vector<1x256xf32>
    %54 = vector.broadcast %53 : vector<1x256xf32> to vector<32x256xf32>
    %55 = arith.mulf %54, %38 : vector<32x256xf32>
    %56 = arith.subf %36, %55 : vector<32x256xf32>
    %cst_38 = arith.constant dense<0.000000e+00> : vector<32xf32>
    %57 = vector.multi_reduction <add>, %56, %cst_38 [1] : vector<32x256xf32> to vector<32xf32>
    %58 = vector.shape_cast %57 : vector<32xf32> to vector<32x1xf32>
    %cst_39 = arith.constant 3.906250e-03 : f32
    %59 = vector.broadcast %cst_39 : f32 to vector<32x1xf32>
    %60 = arith.mulf %58, %59 : vector<32x1xf32>
    %61 = arith.mulf %56, %56 : vector<32x256xf32>
    %cst_40 = arith.constant dense<0.000000e+00> : vector<32xf32>
    %62 = vector.multi_reduction <add>, %61, %cst_40 [1] : vector<32x256xf32> to vector<32xf32>
    %63 = vector.shape_cast %62 : vector<32xf32> to vector<32x1xf32>
    %cst_41 = arith.constant 3.906250e-03 : f32
    %64 = vector.broadcast %cst_41 : f32 to vector<32x1xf32>
    %65 = arith.mulf %63, %64 : vector<32x1xf32>
    %66 = arith.mulf %60, %60 : vector<32x1xf32>
    %67 = arith.subf %65, %66 : vector<32x1xf32>
    %cst_42 = arith.constant 0.000000e+00 : f32
    %68 = vector.broadcast %cst_42 : f32 to vector<32x1xf32>
    %69 = arith.maximumf %67, %68 : vector<32x1xf32>
    %c0_43 = arith.constant 0 : index
    %c0_44 = arith.constant 0 : index
    %70 = vector.load %arg6[%c0_43, %c0_44] : memref<32x1xf32, #tpu.memory_space<vmem>>, vector<32x1xf32>
    %c0_45 = arith.constant 0 : index
    %c0_46 = arith.constant 0 : index
    %71 = vector.load %arg7[%c0_45, %c0_46] : memref<32x1xf32, #tpu.memory_space<vmem>>, vector<32x1xf32>
    %cst_47 = arith.constant 9.99999974E-6 : f32
    %72 = vector.broadcast %cst_47 : f32 to vector<32x1xf32>
    %73 = arith.addf %34, %72 : vector<32x1xf32>
    %74 = arith.divf %34, %73 : vector<32x1xf32>
    %cst_48 = arith.constant 0.000000e+00 : f32
    %75 = vector.broadcast %cst_48 : f32 to vector<32x1xf32>
    %76 = arith.addf %75, %74 : vector<32x1xf32>
    %cst_49 = arith.constant 9.99999974E-6 : f32
    %77 = vector.broadcast %cst_49 : f32 to vector<32x1xf32>
    %78 = arith.addf %69, %77 : vector<32x1xf32>
    %79 = arith.divf %69, %78 : vector<32x1xf32>
    %80 = arith.addf %76, %79 : vector<32x1xf32>
    %cst_50 = arith.constant 5.000000e-01 : f32
    %81 = vector.broadcast %cst_50 : f32 to vector<32x1xf32>
    %82 = arith.mulf %80, %81 : vector<32x1xf32>
    %cst_51 = arith.constant 9.99999974E-6 : f32
    %83 = vector.broadcast %cst_51 : f32 to vector<32x1xf32>
    %84 = arith.addf %82, %83 : vector<32x1xf32>
    %85 = math.rsqrt %84 : vector<32x1xf32>
    %cst_52 = arith.constant 9.99999974E-6 : f32
    %86 = vector.broadcast %cst_52 : f32 to vector<32x1xf32>
    %87 = arith.addf %34, %86 : vector<32x1xf32>
    %88 = math.rsqrt %87 : vector<32x1xf32>
    %89 = arith.mulf %88, %85 : vector<32x1xf32>
    %90 = arith.mulf %89, %70 : vector<32x1xf32>
    %91 = arith.mulf %25, %90 : vector<32x1xf32>
    %92 = arith.subf %71, %91 : vector<32x1xf32>
    %cst_53 = arith.constant 9.99999974E-6 : f32
    %93 = vector.broadcast %cst_53 : f32 to vector<32x1xf32>
    %94 = arith.addf %69, %93 : vector<32x1xf32>
    %95 = math.rsqrt %94 : vector<32x1xf32>
    %96 = arith.mulf %95, %85 : vector<32x1xf32>
    %97 = arith.mulf %96, %70 : vector<32x1xf32>
    %98 = arith.mulf %60, %97 : vector<32x1xf32>
    %99 = arith.subf %71, %98 : vector<32x1xf32>
    %100 = vector.broadcast %90 : vector<32x1xf32> to vector<32x256xf32>
    %101 = arith.mulf %21, %100 : vector<32x256xf32>
    %102 = vector.broadcast %92 : vector<32x1xf32> to vector<32x256xf32>
    %103 = arith.addf %101, %102 : vector<32x256xf32>
    %cst_54 = arith.constant 0.000000e+00 : f32
    %104 = vector.broadcast %cst_54 : f32 to vector<32x256xf32>
    %105 = arith.maximumf %103, %104 : vector<32x256xf32>
    %c0_55 = arith.constant 0 : index
    %c0_56 = arith.constant 0 : index
    %106 = vector.load %arg8[%c0_55, %c0_56] : memref<32x32xf32, #tpu.memory_space<vmem>>, vector<32x32xf32>
    %cst_57 = arith.constant dense<0.000000e+00> : vector<32x256xf32>
    %107 = tpu.matmul %106, %105, %cst_57 {dimension_numbers = #tpu.dot_dimension_numbers<[1], [0], [0], [1], [0, 0, 1, 1], [], []>} : vector<32x32xf32>, vector<32x256xf32>, vector<32x256xf32> -> vector<32x256xf32>
    %c0_58 = arith.constant 0 : index
    %c0_59 = arith.constant 0 : index
    %108 = vector.load %arg9[%c0_58, %c0_59] : memref<32x1xf32, #tpu.memory_space<vmem>>, vector<32x1xf32>
    %109 = vector.broadcast %108 : vector<32x1xf32> to vector<32x256xf32>
    %110 = arith.addf %107, %109 : vector<32x256xf32>
    %cst_60 = arith.constant dense<0.000000e+00> : vector<32xf32>
    %111 = vector.multi_reduction <add>, %110, %cst_60 [1] : vector<32x256xf32> to vector<32xf32>
    %112 = vector.shape_cast %111 : vector<32xf32> to vector<32x1xf32>
    %cst_61 = arith.constant 3.906250e-03 : f32
    %113 = vector.broadcast %cst_61 : f32 to vector<32x1xf32>
    %114 = arith.mulf %112, %113 : vector<32x1xf32>
    %115 = arith.mulf %110, %110 : vector<32x256xf32>
    %cst_62 = arith.constant dense<0.000000e+00> : vector<32xf32>
    %116 = vector.multi_reduction <add>, %115, %cst_62 [1] : vector<32x256xf32> to vector<32xf32>
    %117 = vector.shape_cast %116 : vector<32xf32> to vector<32x1xf32>
    %cst_63 = arith.constant 3.906250e-03 : f32
    %118 = vector.broadcast %cst_63 : f32 to vector<32x1xf32>
    %119 = arith.mulf %117, %118 : vector<32x1xf32>
    %120 = arith.mulf %114, %114 : vector<32x1xf32>
    %121 = arith.subf %119, %120 : vector<32x1xf32>
    %cst_64 = arith.constant 0.000000e+00 : f32
    %122 = vector.broadcast %cst_64 : f32 to vector<32x1xf32>
    %123 = arith.maximumf %121, %122 : vector<32x1xf32>
    %124 = vector.broadcast %97 : vector<32x1xf32> to vector<32x256xf32>
    %125 = arith.mulf %56, %124 : vector<32x256xf32>
    %126 = vector.broadcast %99 : vector<32x1xf32> to vector<32x256xf32>
    %127 = arith.addf %125, %126 : vector<32x256xf32>
    %cst_65 = arith.constant 0.000000e+00 : f32
    %128 = vector.broadcast %cst_65 : f32 to vector<32x256xf32>
    %129 = arith.maximumf %127, %128 : vector<32x256xf32>
    %c0_66 = arith.constant 0 : index
    %c0_67 = arith.constant 0 : index
    %130 = vector.load %arg8[%c0_66, %c0_67] : memref<32x32xf32, #tpu.memory_space<vmem>>, vector<32x32xf32>
    %cst_68 = arith.constant dense<0.000000e+00> : vector<32x256xf32>
    %131 = tpu.matmul %130, %129, %cst_68 {dimension_numbers = #tpu.dot_dimension_numbers<[1], [0], [0], [1], [0, 0, 1, 1], [], []>} : vector<32x32xf32>, vector<32x256xf32>, vector<32x256xf32> -> vector<32x256xf32>
    %c0_69 = arith.constant 0 : index
    %c0_70 = arith.constant 0 : index
    %132 = vector.load %arg9[%c0_69, %c0_70] : memref<32x1xf32, #tpu.memory_space<vmem>>, vector<32x1xf32>
    %133 = vector.broadcast %132 : vector<32x1xf32> to vector<32x256xf32>
    %134 = arith.addf %131, %133 : vector<32x256xf32>
    %cst_71 = arith.constant dense<0.000000e+00> : vector<32xf32>
    %135 = vector.multi_reduction <add>, %134, %cst_71 [1] : vector<32x256xf32> to vector<32xf32>
    %136 = vector.shape_cast %135 : vector<32xf32> to vector<32x1xf32>
    %cst_72 = arith.constant 3.906250e-03 : f32
    %137 = vector.broadcast %cst_72 : f32 to vector<32x1xf32>
    %138 = arith.mulf %136, %137 : vector<32x1xf32>
    %139 = arith.mulf %134, %134 : vector<32x256xf32>
    %cst_73 = arith.constant dense<0.000000e+00> : vector<32xf32>
    %140 = vector.multi_reduction <add>, %139, %cst_73 [1] : vector<32x256xf32> to vector<32xf32>
    %141 = vector.shape_cast %140 : vector<32xf32> to vector<32x1xf32>
    %cst_74 = arith.constant 3.906250e-03 : f32
    %142 = vector.broadcast %cst_74 : f32 to vector<32x1xf32>
    %143 = arith.mulf %141, %142 : vector<32x1xf32>
    %144 = arith.mulf %138, %138 : vector<32x1xf32>
    %145 = arith.subf %143, %144 : vector<32x1xf32>
    %cst_75 = arith.constant 0.000000e+00 : f32
    %146 = vector.broadcast %cst_75 : f32 to vector<32x1xf32>
    %147 = arith.maximumf %145, %146 : vector<32x1xf32>
    %c0_76 = arith.constant 0 : index
    %c0_77 = arith.constant 0 : index
    %148 = vector.load %arg10[%c0_76, %c0_77] : memref<32x1xf32, #tpu.memory_space<vmem>>, vector<32x1xf32>
    %c0_78 = arith.constant 0 : index
    %c0_79 = arith.constant 0 : index
    %149 = vector.load %arg11[%c0_78, %c0_79] : memref<32x1xf32, #tpu.memory_space<vmem>>, vector<32x1xf32>
    %cst_80 = arith.constant 9.99999974E-6 : f32
    %150 = vector.broadcast %cst_80 : f32 to vector<32x1xf32>
    %151 = arith.addf %123, %150 : vector<32x1xf32>
    %152 = arith.divf %123, %151 : vector<32x1xf32>
    %cst_81 = arith.constant 0.000000e+00 : f32
    %153 = vector.broadcast %cst_81 : f32 to vector<32x1xf32>
    %154 = arith.addf %153, %152 : vector<32x1xf32>
    %cst_82 = arith.constant 9.99999974E-6 : f32
    %155 = vector.broadcast %cst_82 : f32 to vector<32x1xf32>
    %156 = arith.addf %147, %155 : vector<32x1xf32>
    %157 = arith.divf %147, %156 : vector<32x1xf32>
    %158 = arith.addf %154, %157 : vector<32x1xf32>
    %cst_83 = arith.constant 5.000000e-01 : f32
    %159 = vector.broadcast %cst_83 : f32 to vector<32x1xf32>
    %160 = arith.mulf %158, %159 : vector<32x1xf32>
    %cst_84 = arith.constant 9.99999974E-6 : f32
    %161 = vector.broadcast %cst_84 : f32 to vector<32x1xf32>
    %162 = arith.addf %160, %161 : vector<32x1xf32>
    %163 = math.rsqrt %162 : vector<32x1xf32>
    %cst_85 = arith.constant 9.99999974E-6 : f32
    %164 = vector.broadcast %cst_85 : f32 to vector<32x1xf32>
    %165 = arith.addf %123, %164 : vector<32x1xf32>
    %166 = math.rsqrt %165 : vector<32x1xf32>
    %167 = arith.mulf %166, %163 : vector<32x1xf32>
    %168 = arith.mulf %167, %148 : vector<32x1xf32>
    %169 = arith.mulf %114, %168 : vector<32x1xf32>
    %170 = arith.subf %149, %169 : vector<32x1xf32>
    %cst_86 = arith.constant 9.99999974E-6 : f32
    %171 = vector.broadcast %cst_86 : f32 to vector<32x1xf32>
    %172 = arith.addf %147, %171 : vector<32x1xf32>
    %173 = math.rsqrt %172 : vector<32x1xf32>
    %174 = arith.mulf %173, %163 : vector<32x1xf32>
    %175 = arith.mulf %174, %148 : vector<32x1xf32>
    %176 = arith.mulf %138, %175 : vector<32x1xf32>
    %177 = arith.subf %149, %176 : vector<32x1xf32>
    %178 = vector.broadcast %168 : vector<32x1xf32> to vector<32x256xf32>
    %179 = arith.mulf %110, %178 : vector<32x256xf32>
    %180 = vector.broadcast %170 : vector<32x1xf32> to vector<32x256xf32>
    %181 = arith.addf %179, %180 : vector<32x256xf32>
    %cst_87 = arith.constant 0.000000e+00 : f32
    %182 = vector.broadcast %cst_87 : f32 to vector<32x256xf32>
    %183 = arith.maximumf %181, %182 : vector<32x256xf32>
    %c0_88 = arith.constant 0 : index
    %c0_89 = arith.constant 0 : index
    %184 = vector.load %arg12[%c0_88, %c0_89] : memref<32x32xf32, #tpu.memory_space<vmem>>, vector<32x32xf32>
    %cst_90 = arith.constant dense<0.000000e+00> : vector<32x256xf32>
    %185 = tpu.matmul %184, %183, %cst_90 {dimension_numbers = #tpu.dot_dimension_numbers<[1], [0], [0], [1], [0, 0, 1, 1], [], []>} : vector<32x32xf32>, vector<32x256xf32>, vector<32x256xf32> -> vector<32x256xf32>
    %c0_91 = arith.constant 0 : index
    %c0_92 = arith.constant 0 : index
    %186 = vector.load %arg13[%c0_91, %c0_92] : memref<32x1xf32, #tpu.memory_space<vmem>>, vector<32x1xf32>
    %187 = vector.broadcast %186 : vector<32x1xf32> to vector<32x256xf32>
    %188 = arith.addf %185, %187 : vector<32x256xf32>
    %c0_93 = arith.constant 0 : index
    %c0_94 = arith.constant 0 : index
    %c0_95 = arith.constant 0 : index
    %189 = vector.load %arg14[%c0_93, %c0_94, %c0_95] : memref<2x32x256xf32, #tpu.memory_space<vmem>>, vector<1x32x256xf32>
    %190 = vector.shape_cast %189 : vector<1x32x256xf32> to vector<32x256xf32>
    %191 = vector.shape_cast %188 : vector<32x256xf32> to vector<1x32x256xf32>
    tpu.vector_store %arg14[%c0_93, %c0_94, %c0_95], %191 {strides = array<i32>} : memref<2x32x256xf32, #tpu.memory_space<vmem>>, vector<1x32x256xf32>,
    %192 = vector.broadcast %175 : vector<32x1xf32> to vector<32x256xf32>
    %193 = arith.mulf %134, %192 : vector<32x256xf32>
    %194 = vector.broadcast %177 : vector<32x1xf32> to vector<32x256xf32>
    %195 = arith.addf %193, %194 : vector<32x256xf32>
    %cst_96 = arith.constant 0.000000e+00 : f32
    %196 = vector.broadcast %cst_96 : f32 to vector<32x256xf32>
    %197 = arith.maximumf %195, %196 : vector<32x256xf32>
    %c0_97 = arith.constant 0 : index
    %c0_98 = arith.constant 0 : index
    %198 = vector.load %arg12[%c0_97, %c0_98] : memref<32x32xf32, #tpu.memory_space<vmem>>, vector<32x32xf32>
    %cst_99 = arith.constant dense<0.000000e+00> : vector<32x256xf32>
    %199 = tpu.matmul %198, %197, %cst_99 {dimension_numbers = #tpu.dot_dimension_numbers<[1], [0], [0], [1], [0, 0, 1, 1], [], []>} : vector<32x32xf32>, vector<32x256xf32>, vector<32x256xf32> -> vector<32x256xf32>
    %c0_100 = arith.constant 0 : index
    %c0_101 = arith.constant 0 : index
    %200 = vector.load %arg13[%c0_100, %c0_101] : memref<32x1xf32, #tpu.memory_space<vmem>>, vector<32x1xf32>
    %201 = vector.broadcast %200 : vector<32x1xf32> to vector<32x256xf32>
    %202 = arith.addf %199, %201 : vector<32x256xf32>
    %c1_102 = arith.constant 1 : index
    %c0_103 = arith.constant 0 : index
    %c0_104 = arith.constant 0 : index
    %203 = vector.load %arg14[%c1_102, %c0_103, %c0_104] : memref<2x32x256xf32, #tpu.memory_space<vmem>>, vector<1x32x256xf32>
    %204 = vector.shape_cast %203 : vector<1x32x256xf32> to vector<32x256xf32>
    %205 = vector.shape_cast %202 : vector<32x256xf32> to vector<1x32x256xf32>
    tpu.vector_store %arg14[%c1_102, %c0_103, %c0_104], %205 {strides = array<i32>} : memref<2x32x256xf32, #tpu.memory_space<vmem>>, vector<1x32x256xf32>,
    return
  }
}

</mosaic_0001>

<bundles_post_ra>
// kernel: tpu_custom_call.1
= control target key start
LH: loop header
LB: loop body
LE: loop exit
PB: predicated region body
PF: predicated region fallthrough
CT: control target
= control target key end

     0   :  { %20 = vsyncpa [#allocation4], 0  ;;  %s2591_s0 = inlined_call_operand.vmem [shape: f32[2,32,256], index: 0, kind: input, shape index: {}]   ;;  %s2592_s1 = inlined_call_operand.hbm [shape: f32[2,32,256], index: 1, kind: input, shape index: {}]   ;;  %s2593_s2 = inlined_call_operand.hbm [shape: f32[2,32,256], index: 2, kind: input, shape index: {}]   ;;  %s2594_s3 = inlined_call_operand.vmem [shape: f32[1,32], index: 3, kind: input, shape index: {}]   ;;  %s2595_s4 = inlined_call_operand.vmem [shape: f32[1,32], index: 4, kind: input, shape index: {}]   ;;  %s2596_s5 = inlined_call_operand.<no memory space> [shape: f32[1,1], index: 5, kind: input, shape index: {}]   ;;  %s2597_s6 = inlined_call_operand.vmem [shape: f32[32,1], index: 6, kind: input, shape index: {}]   ;;  %s2598_s7 = inlined_call_operand.vmem [shape: f32[32,1], index: 7, kind: input, shape index: {}]   ;;  %s2599_s8 = inlined_call_operand.vmem [shape: f32[32,32], index: 8, kind: input, shape index: {}]   ;;  %s2600_s9 = inlined_call_operand.vmem [shape: f32[32,1], index: 9, kind: input, shape index: {}]   ;;  %s2601_s10 = inlined_call_operand.vmem [shape: f32[32,1], index: 10, kind: input, shape index: {}]   ;;  %s2602_s11 = inlined_call_operand.vmem [shape: f32[32,1], index: 11, kind: input, shape index: {}]   ;;  %s2603_s12 = inlined_call_operand.vmem [shape: f32[32,32], index: 12, kind: input, shape index: {}]   ;;  %s2604_s13 = inlined_call_operand.vmem [shape: f32[32,1], index: 13, kind: input, shape index: {}]   ;;  %s2605_s14 = inlined_call_operand.hbm [shape: f32[2,32,256], index: 14, kind: output, shape index: {}]  }
   0x1   :  { %21 = vsyncpa [#allocation7], 0 }
   0x2   :  { %22 = vsyncpa [#allocation5], 0  ;;  %s1935_s29 = smov [#allocation3]   ;;  %s1863_s17 = scalar_lea.hbm %s2592_s1, 2048 }
   0x3   :  { %s30_s30 = sshll.u32 %s1935_s29, 4  ;;  %p1864_p0 = scmp.ne.s32.totalorder %s2592_s1, %s1863_s17  ;;  %s31_s30 = int_to_ptr.vmem [resolvable:$true] %s30_s30 }
   0x4   :  { %p1867_p1 = scmp.lt.u32.totalorder %s1863_s17, %s2592_s1 }
   0x6   :  { %p1869_p2 = pnand %p1867_p1, %p1864_p0 }
   0x8   :  { %1872 = shalt.err (!%p1869_p2)
}
   0x9   :  { %s1873_s22 = scalar_lea.vmem %s31_s30, 2048  ;;  %p1878_p4 = scmp.lt.s32.totalorder %s31_s30, %s31_s30 }
   0xa   :  { %p1874_p3 = scmp.ne.s32.totalorder %s31_s30, %s1873_s22  ;;  %p1879_p5 = scmp.lt.s32.totalorder %s1873_s22, %s1873_s22 }
   0xc   :  { %p1880_p6 = por %p1879_p5, %p1878_p4 }
   0xe   :  { %p1881_p7 = pnand %p1880_p6, %p1874_p3 }
  0x10   :  { %1884 = shalt.err (!%p1881_p7)
}
  0x11   :  { %s1936_s23 = smov 256   ;;  %s1937_s24 = smov 16  }
  0x12   :  { %36 = dma.hbm_to_vmem [thread:$0]  %s2592_s1, 2048, %s31_s30, [#allocation4], %s1936_s23, %s1936_s23, %s1937_s24  }
  0x13   :  { %s1938_s27 = smov [#allocation6]   ;;  %s1885_s16 = scalar_lea.hbm %s2593_s2, 2048 }
  0x14   :  { %s42_s28 = sshll.u32 %s1938_s27, 4  ;;  %p1886_p8 = scmp.ne.s32.totalorder %s2593_s2, %s1885_s16  ;;  %s43_s28 = int_to_ptr.vmem [resolvable:$true] %s42_s28 }
  0x15   :  { %p1889_p9 = scmp.lt.u32.totalorder %s1885_s16, %s2593_s2 }
  0x17   :  { %p1891_p10 = pnand %p1889_p9, %p1886_p8 }
  0x19   :  { %1894 = shalt.err (!%p1891_p10)
}
  0x1a   :  { %s1895_s21 = scalar_lea.vmem %s43_s28, 2048  ;;  %p1900_p12 = scmp.lt.s32.totalorder %s43_s28, %s43_s28 }
  0x1b   :  { %p1896_p11 = scmp.ne.s32.totalorder %s43_s28, %s1895_s21  ;;  %p1901_p13 = scmp.lt.s32.totalorder %s1895_s21, %s1895_s21 }
  0x1d   :  { %p1902_p0 = por %p1901_p13, %p1900_p12 }
  0x1f   :  { %p1903_p1 = pnand %p1902_p0, %p1896_p11 }
  0x21   :  { %1906 = shalt.err (!%p1903_p1)
}
  0x22   :  { %48 = dma.hbm_to_vmem [thread:$0]  %s2593_s2, 2048, %s43_s28, [#allocation7], %s1936_s23, %s1936_s23, %s1937_s24  }
  0x23   :  { %1929 = dma.done.wait [#allocation4], 2048  }
  0x24   :  { %1930 = vsyncadd [#allocation4], 4294965248 }
  0x25   :  { %1931 = dma.done.wait [#allocation7], 2048  }
  0x26   :  { %1932 = vsyncadd [#allocation7], 4294965248  ;;  %v1939_v0 = vmov 0.0   ;;  %v94_v1 = vld [vmem:[#allocation3 + $0x8] sm:$0xff]  ;;  %v96_v2 = vld [vmem:[#allocation3 + $0x18] sm:$0xff]  ;;  %vm103_vm0 = vcmask 261120   ;;  %v253_v51 = vstv %s2596_s5 }
  0x27   :  { %171 = vmatprep.mubr.f32.mxu0 %v1939_v0  ;;  %435 = vmatprep.mubr.f32.mxu1 %v1939_v0  ;;  %v364_v3 = vld [vmem:[#allocation3 + $0x48] sm:$0xff]  ;;  %v1690_v4 = vpack.c.bf16 %v96_v2, %v94_v1  ;;  %v366_v5 = vld [vmem:[#allocation3 + $0x58] sm:$0xff]  ;;  %v93_v6 = vld [vmem:[#allocation3] sm:$0xff] }
  0x28   :  { %v95_v7 = vld [vmem:[#allocation3 + $0x10] sm:$0xff]  ;;  %v1706_v8 = vpack.c.bf16 %v366_v5, %v364_v3  ;;  %v363_v10 = vld [vmem:[#allocation3 + $0x40] sm:$0xff]  ;;  %v98_v12 = vld [vmem:[#allocation3 + $0x28] sm:$0xff] }
  0x29   :  { %v1692_v9 = vpack.c.bf16 %v95_v7, %v93_v6  ;;  %v365_v11 = vld [vmem:[#allocation3 + $0x50] sm:$0xff]  ;;  %1691 = vmatprep.subr.bf16.mxu0 %v1690_v4  ;;  %v100_v14 = vld [vmem:[#allocation3 + $0x38] sm:$0xff]  ;;  %v368_v15 = vld [vmem:[#allocation3 + $0x68] sm:$0xff]  ;;  %v268_v6 = vlaneseq }
  0x2a   :  { %v1708_v13 = vpack.c.bf16 %v365_v11, %v363_v10  ;;  %v370_v16 = vld [vmem:[#allocation3 + $0x78] sm:$0xff]  ;;  %1707 = vmatprep.subr.bf16.mxu1 %v1706_v8  ;;  %v1694_v17 = vpack.c.bf16 %v100_v14, %v98_v12  ;;  %v97_v19 = vld [vmem:[#allocation3 + $0x20] sm:$0xff]  ;;  %v99_v20 = vld [vmem:[#allocation3 + $0x30] sm:$0xff] }
  0x2b   :  { %1693 = vmatpush1.bf16.msra.mxu0 %v1692_v9  ;;  %v1710_v18 = vpack.c.bf16 %v370_v16, %v368_v15  ;;  %v367_v21 = vld [vmem:[#allocation3 + $0x60] sm:$0xff]  ;;  %v1696_v22 = vpack.c.bf16 %v99_v20, %v97_v19  ;;  %v369_v23 = vld [vmem:[#allocation3 + $0x70] sm:$0xff]  ;;  %v2052_v24 = vld [vmem:[%s2591_s0 + $0x8] sm:$0xff]  ;;  %v269_v10 = vshrl.u32 %v268_v6, 7 }
  0x2c   :  { %1709 = vmatpush1.bf16.msra.mxu1 %v1708_v13  ;;  %1695 = vmatprep.subr.bf16.mxu0 %v1694_v17  ;;  %v1712_v25 = vpack.c.bf16 %v369_v23, %v367_v21  ;;  %v102_v26 = vld [vmem:[%s2595_s4] sm:$0x1]  ;;  %v2060_v27 = vld [vmem:[%s2591_s0 + $0x18] sm:$0xff]  ;;  %v2065_v28 = vld [vmem:[%s2591_s0 + $0x48] sm:$0xff] }
  0x2d   :  { %1711 = vmatprep.subr.bf16.mxu1 %v1710_v18  ;;  %v2070_v29 = vld [vmem:[%s2591_s0 + $0x58] sm:$0xff]  ;;  %v1698_v30 = vpack.c.bf16 %v2060_v27, %v2052_v24  ;;  %v2079_v32 = vld [vmem:[%s2591_s0] sm:$0xff]  ;;  %v2084_v33 = vld [vmem:[%s2591_s0 + $0x10] sm:$0xff]  ;;  %v270_v11 = vsub.s32 0, %v269_v10 }
  0x2e   :  { %v1714_v31 = vpack.c.bf16 %v2070_v29, %v2065_v28  ;;  %v2089_v34 = vld [vmem:[%s2591_s0 + $0x40] sm:$0xff]  ;;  %v1700_v35 = vpack.c.bf16 %v2084_v33, %v2079_v32  ;;  %v2096_v36 = vld [vmem:[%s2591_s0 + $0x50] sm:$0xff]  ;;  %v2101_v37 = vld [vmem:[%s2591_s0 + $0x28] sm:$0xff] }
  0x2f   :  { %1697 = vmatpush1.bf16.msra.mxu0 %v1696_v22  ;;  %v2106_v38 = vld [vmem:[%s2591_s0 + $0x38] sm:$0xff]  ;;  %v1716_v39 = vpack.c.bf16 %v2096_v36, %v2089_v34  ;;  %v2115_v41 = vld [vmem:[%s2591_s0 + $0x68] sm:$0xff]  ;;  %v2125_v43 = vld [vmem:[%s2591_s0 + $0x20] sm:$0xff] }
  0x30   :  { %1713 = vmatpush1.bf16.msra.mxu1 %v1712_v25  ;;  %1699 = vmatprep.subr.bf16.mxu0 %v1698_v30  ;;  %v1702_v40 = vpack.c.bf16 %v2106_v38, %v2101_v37  ;;  %v2120_v42 = vld [vmem:[%s2591_s0 + $0x78] sm:$0xff]  ;;  %v2132_v45 = vld [vmem:[%s2591_s0 + $0x30] sm:$0xff]  ;;  %v2137_v46 = vld [vmem:[%s2591_s0 + $0x60] sm:$0xff] }
  0x31   :  { %1715 = vmatprep.subr.bf16.mxu1 %v1714_v31  ;;  %v1718_v44 = vpack.c.bf16 %v2120_v42, %v2115_v41  ;;  %v2142_v47 = vld [vmem:[%s2591_s0 + $0x70] sm:$0xff]  ;;  %v1704_v48 = vpack.c.bf16 %v2132_v45, %v2125_v43  ;;  %v101_v50 = vld [vmem:[%s2594_s3] sm:$0x1]  ;;  %v86_v19 = vld [vmem:[#allocation6 + $0x8] sm:$0xff] }
  0x32   :  { %1658 = vmatmul.mubr.msk.f32.vlgmr.msra.gmra.mrb[0].mxu0 %vm103_vm0, %v102_v26  ;;  %v1720_v49 = vpack.c.bf16 %v2142_v47, %v2137_v46  ;;  %v85_v13 = vld [vmem:[#allocation6] sm:$0xff]  ;;  %v87_v20 = vld [vmem:[#allocation6 + $0x10] sm:$0xff]  ;;  %v88_v21 = vld [vmem:[#allocation6 + $0x18] sm:$0xff] }
  0x33   :  { %1670 = vmatmul.mubr.msk.f32.vlgmr.msra.gmra.mrb[0].mxu1 %vm103_vm0, %v102_v26  ;;  %1701 = vmatpush1.bf16.msra.mxu0 %v1700_v35  ;;  %v354_v15 = vld [vmem:[#allocation6 + $0x40] sm:$0xff]  ;;  %v355_v23 = vld [vmem:[#allocation6 + $0x48] sm:$0xff]  ;;  %v356_v30 = vld [vmem:[#allocation6 + $0x50] sm:$0xff] }
  0x34   :  { %1717 = vmatpush1.bf16.msra.mxu1 %v1716_v39  ;;  %1703 = vmatprep.subr.bf16.mxu0 %v1702_v40  ;;  %v357_v31 = vld [vmem:[#allocation6 + $0x58] sm:$0xff] }
  0x35   :  { %1719 = vmatprep.subr.bf16.mxu1 %v1718_v44  ;;  %245 = vmatprep.mubr.f32.mxu0 %v1939_v0 }
  0x36   :  { %506 = vmatprep.mubr.f32.mxu1 %v1939_v0 }
  0x37   :  { %1705 = vmatpush1.bf16.msra.mxu0 %v1704_v48 }
  0x38   :  { %1721 = vmatpush1.bf16.msra.mxu1 %v1720_v49 }
  0x3a   :  { %1659 = vmatmul.mubr.msk.f32.vlgmr.msra.gmra.mrb[0].mxu0 %vm103_vm0, %v101_v50 }
  0x3b   :  { %1671 = vmatmul.mubr.msk.f32.vlgmr.msra.gmra.mrb[0].mxu1 %vm103_vm0, %v101_v50  ;;  %863 = vmatprep.mubr.f32.mxu0 %v1939_v0  ;;  %v91_v50 = vld [vmem:[#allocation6 + $0x30] sm:$0xff] }
  0x3c   :  { %1068 = vmatprep.mubr.f32.mxu1 %v1939_v0 }
 0x10d   :  { %v247_v52 = vpop.f32.mrb[0].mxu0 }
 0x10e   :  { %v254_v53 = vadd.f32 %v253_v51, %v247_v52  ;;  %v508_v54 = vpop.f32.mrb[0].mxu1  ;;  %v249_v55 = vpop.f32.mrb[1].mxu0 }
 0x10f   :  { %v513_v56 = vadd.f32 %v508_v54, %v253_v51  ;;  %v255_v57 = vadd.f32 %v253_v51, %v249_v55  ;;  %v510_v58 = vpop.f32.mrb[1].mxu1 }
 0x110   :  { %v1660_v59 = vmul.f32 -1.442695, %v254_v53  ;;  %v514_v60 = vadd.f32 %v510_v58, %v253_v51  ;;  %v89_v51 = vld [vmem:[#allocation6 + $0x20] sm:$0xff]  ;;  %v92_v58 = vld [vmem:[#allocation6 + $0x38] sm:$0xff] }
 0x111   :  { %v1672_v61 = vmul.f32 -1.442695, %v513_v56  ;;  %v1661_v62 = vmul.f32 -1.442695, %v255_v57  ;;  %v90_v56 = vld [vmem:[#allocation6 + $0x28] sm:$0xff] }
 0x112   :  { %1767 = vpow2.f32 %v1660_v59  ;;  %v1673_v63 = vmul.f32 -1.442695, %v514_v60 }
 0x113   :  { %1769 = vpow2.f32 %v1672_v61 }
 0x114   :  { %1771 = vpow2.f32 %v1661_v62 }
 0x115   :  { %1773 = vpow2.f32 %v1673_v63 }
 0x11c   :  { %v1768_v1 = vpop.eup %1767 }
 0x11d   :  { %v1770_v2 = vpop.eup %1769  ;;  %v262_v3 = vadd.f32 1.0, %v1768_v1 }
 0x11e   :  { %v1772_v4 = vpop.eup %1771  ;;  %v521_v5 = vadd.f32 1.0, %v1770_v2 }
 0x11f   :  { %v1774_v7 = vpop.eup %1773  ;;  %1775 = vrcp.f32 %v262_v3  ;;  %v263_v8 = vadd.f32 1.0, %v1772_v4  ;;  %v358_v3 = vld [vmem:[#allocation6 + $0x60] sm:$0xff]  ;;  %v359_v4 = vld [vmem:[#allocation6 + $0x68] sm:$0xff] }
 0x120   :  { %1777 = vrcp.f32 %v521_v5  ;;  %v522_v9 = vadd.f32 1.0, %v1774_v7  ;;  %v360_v5 = vld [vmem:[#allocation6 + $0x70] sm:$0xff] }
 0x121   :  { %1779 = vrcp.f32 %v263_v8 }
 0x122   :  { %1781 = vrcp.f32 %v522_v9 }
 0x129   :  { %v1776_v12 = vpop.eup %1775 }
 0x12a   :  { %v1778_v14 = vpop.eup %1777  ;;  %v271_v16 = vrot.slane %v1776_v12, %v270_v11 }
 0x12b   :  { %v1780_v17 = vpop.eup %1779  ;;  %v530_v18 = vrot.slane %v1778_v14, %v270_v11 }
 0x12c   :  { %v1782_v22 = vpop.eup %1781  ;;  %v275_v25 = vrot.slane %v1780_v17, %v270_v11  ;;  %v276_v26 = vmul.f32 %v271_v16, %v85_v13  ;;  %v278_v48 = vmul.f32 %v271_v16, %v87_v20  ;;  %v280_v60 = vmul.f32 %v271_v16, %v89_v51 }
 0x12d   :  { %v534_v35 = vrot.slane %v1782_v22, %v270_v11  ;;  %v535_v39 = vmul.f32 %v530_v18, %v354_v15  ;;  %v537_v54 = vmul.f32 %v530_v18, %v356_v30  ;;  %v541_v11 = vmul.f32 %v530_v18, %v360_v5 }
 0x12e   :  { %v277_v40 = vmul.f32 %v275_v25, %v86_v19  ;;  %v2163_v44 = vsub.f32 %v2079_v32, %v276_v26  ;;  %v279_v49 = vmul.f32 %v275_v25, %v88_v21  ;;  %v282_v32 = vmul.f32 %v271_v16, %v91_v50 }
 0x12f   :  { %v536_v52 = vmul.f32 %v534_v35, %v355_v23  ;;  %v2166_v53 = vsub.f32 %v2089_v34, %v535_v39  ;;  %v538_v55 = vmul.f32 %v534_v35, %v357_v31  ;;  %v2177_v62 = vsub.f32 %v2084_v33, %v278_v48  ;;  %v361_v33 = vld [vmem:[#allocation6 + $0x78] sm:$0xff] }
 0x130   :  { %v2169_v57 = vsub.f32 %v2052_v24, %v277_v40  ;;  %v2180_v34 = vsub.f32 %v2060_v27, %v279_v49  ;;  %v281_v63 = vmul.f32 %v275_v25, %v90_v56  ;;  %v2185_v1 = vsub.f32 %v2096_v36, %v537_v54 }
 0x131   :  { %v2172_v59 = vsub.f32 %v2065_v28, %v536_v52  ;;  %v2188_v28 = vsub.f32 %v2070_v29, %v538_v55  ;;  %v283_v2 = vmul.f32 %v275_v25, %v92_v58  ;;  %v2191_v27 = vsub.f32 %v2132_v45, %v282_v32 }
 0x132   :  { %v292_v61 = vadd.f32 %v2169_v57, %v2163_v44  ;;  %v2194_v6 = vsub.f32 %v2125_v43, %v280_v60  ;;  %v295_v36 = vadd.f32 %v2180_v34, %v2177_v62  ;;  %v2199_v7 = vsub.f32 %v2101_v37, %v281_v63 }
 0x133   :  { %v551_v24 = vadd.f32 %v2172_v59, %v2166_v53  ;;  %v539_v29 = vmul.f32 %v530_v18, %v358_v3  ;;  %v540_v8 = vmul.f32 %v534_v35, %v359_v4  ;;  %v554_v9 = vadd.f32 %v2188_v28, %v2185_v1 }
 0x134   :  { %293 = vadd.xlane.f32.xlu0 %v292_v61  ;;  %v2204_v10 = vsub.f32 %v2106_v38, %v283_v2  ;;  %v542_v45 = vmul.f32 %v534_v35, %v361_v33  ;;  %v298_v43 = vadd.f32 %v2199_v7, %v2194_v6  ;;  %v2217_v14 = vsub.f32 %v2142_v47, %v541_v11 }
 0x135   :  { %552 = vadd.xlane.f32.xlu1 %v551_v24  ;;  %v2209_v12 = vsub.f32 %v2137_v46, %v539_v29  ;;  %v2212_v37 = vsub.f32 %v2115_v41, %v540_v8  ;;  %v308_v46 = vmul.f32 %v2163_v44, %v2163_v44  ;;  %v309_v41 = vmul.f32 %v2169_v57, %v2169_v57 }
 0x136   :  { %v301_v13 = vadd.f32 %v2204_v10, %v2191_v27  ;;  %v2220_v38 = vsub.f32 %v2120_v42, %v542_v45  ;;  %v310_v47 = vmul.f32 %v2177_v62, %v2177_v62  ;;  %v311_v42 = vmul.f32 %v2180_v34, %v2180_v34 }
 0x137   :  { %v557_v15 = vadd.f32 %v2212_v37, %v2209_v12  ;;  %v316_v17 = vadd.f32 %v309_v41, %v308_v46  ;;  %v567_v18 = vmul.f32 %v2166_v53, %v2166_v53  ;;  %v568_v19 = vmul.f32 %v2172_v59, %v2172_v59 }
 0x138   :  { %296 = vadd.xlane.f32.xlu0 %v295_v36  ;;  %v560_v16 = vadd.f32 %v2220_v38, %v2217_v14  ;;  %v319_v20 = vadd.f32 %v311_v42, %v310_v47  ;;  %v569_v21 = vmul.f32 %v2185_v1, %v2185_v1  ;;  %v570_v22 = vmul.f32 %v2188_v28, %v2188_v28 }
 0x139   :  { %555 = vadd.xlane.f32.xlu1 %v554_v9  ;;  %v575_v23 = vadd.f32 %v568_v19, %v567_v18  ;;  %v312_v25 = vmul.f32 %v2194_v6, %v2194_v6  ;;  %v313_v26 = vmul.f32 %v2199_v7, %v2199_v7  ;;  %v314_v31 = vmul.f32 %v2191_v27, %v2191_v27 }
 0x13a   :  { %v578_v30 = vadd.f32 %v570_v22, %v569_v21  ;;  %v315_v35 = vmul.f32 %v2204_v10, %v2204_v10  ;;  %v571_v40 = vmul.f32 %v2209_v12, %v2209_v12  ;;  %v572_v48 = vmul.f32 %v2212_v37, %v2212_v37 }
 0x13b   :  { %v322_v39 = vadd.f32 %v313_v26, %v312_v25  ;;  %v573_v50 = vmul.f32 %v2217_v14, %v2217_v14  ;;  %v574_v51 = vmul.f32 %v2220_v38, %v2220_v38  ;;  %v1940_v55 = vmov 0  }
 0x13c   :  { %299 = vadd.xlane.f32.xlu0 %v298_v43  ;;  %v325_v49 = vadd.f32 %v315_v35, %v314_v31  ;;  %v581_v52 = vadd.f32 %v572_v48, %v571_v40  ;;  %1766 = vset.pattern.permute.xlu1 %v1940_v55 }
 0x13d   :  { %302 = vadd.xlane.f32.xlu1 %v301_v13  ;;  %v584_v54 = vadd.f32 %v574_v51, %v573_v50  ;;  %1765 = vset.pattern.permute.xlu0 %v1940_v55 }
 0x140   :  { %558 = vadd.xlane.f32.xlu0 %v557_v15 }
 0x141   :  { %561 = vadd.xlane.f32.xlu1 %v560_v16 }
 0x144   :  { %317 = vadd.xlane.f32.xlu0 %v316_v17 }
 0x145   :  { %320 = vadd.xlane.f32.xlu1 %v319_v20 }
 0x148   :  { %576 = vadd.xlane.f32.xlu0 %v575_v23 }
 0x149   :  { %579 = vadd.xlane.f32.xlu1 %v578_v30 }
 0x14c   :  { %323 = vadd.xlane.f32.xlu0 %v322_v39 }
 0x14d   :  { %326 = vadd.xlane.f32.xlu1 %v325_v49 }
 0x150   :  { %582 = vadd.xlane.f32.xlu0 %v581_v52 }
 0x151   :  { %585 = vadd.xlane.f32.xlu1 %v584_v54 }
 0x1c1   :  { %v294_v56 = vpop.xlane.xlu0 %293 }
 0x1c2   :  { %v553_v58 = vpop.xlane.xlu1 %552  ;;  %v2258_v2 = vmul.f32 0.00390625, %v294_v56 }
 0x1c3   :  { %v2262_v33 = vmul.f32 0.00390625, %v553_v58 }
 0x1c4   :  { %v332_v36 = vmul.f32 %v2258_v2, %v2258_v2 }
 0x1c5   :  { %v297_v32 = vpop.xlane.xlu0 %296  ;;  %v591_v46 = vmul.f32 %v2262_v33, %v2262_v33 }
 0x1c6   :  { %v556_v60 = vpop.xlane.xlu1 %555  ;;  %v2260_v4 = vmul.f32 0.00390625, %v297_v32 }
 0x1c7   :  { %v2266_v9 = vmul.f32 0.00390625, %v556_v60 }
 0x1c8   :  { %v333_v11 = vmul.f32 %v2260_v4, %v2260_v4 }
 0x1c9   :  { %v300_v61 = vpop.xlane.xlu0 %299  ;;  %v592_v17 = vmul.f32 %v2266_v9, %v2266_v9 }
 0x1ca   :  { %v303_v63 = vpop.xlane.xlu1 %302  ;;  %v2272_v41 = vmul.f32 0.00390625, %v300_v61 }
 0x1cb   :  { %v2276_v18 = vmul.f32 0.00390625, %v303_v63 }
 0x1cc   :  { %v334_v30 = vmul.f32 %v2272_v41, %v2272_v41 }
 0x1cd   :  { %v559_v24 = vpop.xlane.xlu0 %558  ;;  %v335_v48 = vmul.f32 %v2276_v18, %v2276_v18 }
 0x1ce   :  { %v562_v3 = vpop.xlane.xlu1 %561  ;;  %v2280_v31 = vmul.f32 0.00390625, %v559_v24 }
 0x1cf   :  { %v2284_v49 = vmul.f32 0.00390625, %v562_v3 }
 0x1d0   :  { %v593_v32 = vmul.f32 %v2280_v31, %v2280_v31 }
 0x1d1   :  { %v318_v5 = vpop.xlane.xlu0 %317  ;;  %v594_v24 = vmul.f32 %v2284_v49, %v2284_v49 }
 0x1d2   :  { %v321_v29 = vpop.xlane.xlu1 %320  ;;  %v328_v8 = vmul.f32 0.00390625, %v318_v5 }
 0x1d3   :  { %v329_v45 = vmul.f32 0.00390625, %v321_v29 }
 0x1d4   :  { %v336_v43 = vsub.f32 %v328_v8, %v332_v36 }
 0x1d5   :  { %v337_v13 = vsub.f32 %v329_v45, %v333_v11  ;;  %v577_v15 = vpop.xlane.xlu0 %576 }
 0x1d6   :  { %v340_v16 = vmax.f32 %v336_v43, 0.0  ;;  %v580_v47 = vpop.xlane.xlu1 %579  ;;  %v587_v42 = vmul.f32 0.00390625, %v577_v15 }
 0x1d7   :  { %v341_v19 = vmax.f32 %v337_v13, 0.0  ;;  %v588_v20 = vmul.f32 0.00390625, %v580_v47 }
 0x1d8   :  { %v611_v21 = vadd.f32 1e-05, %v340_v16  ;;  %v595_v22 = vsub.f32 %v587_v42, %v591_v46 }
 0x1d9   :  { %v612_v23 = vadd.f32 1e-05, %v341_v19  ;;  %v596_v25 = vsub.f32 %v588_v20, %v592_v17  ;;  %v324_v26 = vpop.xlane.xlu0 %323 }
 0x1da   :  { %v599_v35 = vmax.f32 %v595_v22, 0.0  ;;  %v327_v39 = vpop.xlane.xlu1 %326  ;;  %v330_v40 = vmul.f32 0.00390625, %v324_v26  ;;  %1783 = vrcp.f32 %v611_v21 }
 0x1db   :  { %v600_v50 = vmax.f32 %v596_v25, 0.0  ;;  %v331_v51 = vmul.f32 0.00390625, %v327_v39  ;;  %1785 = vrcp.f32 %v612_v23 }
 0x1dc   :  { %v627_v52 = vadd.f32 1e-05, %v599_v35  ;;  %v338_v54 = vsub.f32 %v330_v40, %v334_v30 }
 0x1dd   :  { %v628_v55 = vadd.f32 1e-05, %v600_v50  ;;  %v339_v56 = vsub.f32 %v331_v51, %v335_v48  ;;  %v583_v58 = vpop.xlane.xlu0 %582 }
 0x1de   :  { %1787 = vrcp.f32 %v627_v52  ;;  %v342_v60 = vmax.f32 %v338_v54, 0.0  ;;  %v586_v61 = vpop.xlane.xlu1 %585  ;;  %v589_v63 = vmul.f32 0.00390625, %v583_v58 }
 0x1df   :  { %1789 = vrcp.f32 %v628_v55  ;;  %v343_v3 = vmax.f32 %v339_v56, 0.0  ;;  %v590_v5 = vmul.f32 0.00390625, %v586_v61 }
 0x1e0   :  { %v613_v36 = vadd.f32 1e-05, %v342_v60  ;;  %v597_v29 = vsub.f32 %v589_v63, %v593_v32 }
 0x1e1   :  { %v614_v8 = vadd.f32 1e-05, %v343_v3  ;;  %v598_v11 = vsub.f32 %v590_v5, %v594_v24 }
 0x1e2   :  { %v601_v45 = vmax.f32 %v597_v29, 0.0  ;;  %1791 = vrcp.f32 %v613_v36 }
 0x1e3   :  { %v602_v43 = vmax.f32 %v598_v11, 0.0  ;;  %1793 = vrcp.f32 %v614_v8 }
 0x1e4   :  { %v629_v13 = vadd.f32 1e-05, %v601_v45  ;;  %v1784_v46 = vpop.eup %1783 }
 0x1e5   :  { %v630_v15 = vadd.f32 1e-05, %v602_v43  ;;  %v1786_v47 = vpop.eup %1785  ;;  %v616_v20 = vmul.f32 %v1784_v46, %v340_v16 }
 0x1e6   :  { %1795 = vrcp.f32 %v629_v13  ;;  %v618_v25 = vmul.f32 %v1786_v47, %v341_v19 }
 0x1e7   :  { %1797 = vrcp.f32 %v630_v15 }
 0x1e8   :  { %v1788_v42 = vpop.eup %1787  ;;  %1799 = vrsqrt.f32 %v612_v23 }
 0x1e9   :  { %v1790_v17 = vpop.eup %1789  ;;  %v632_v22 = vmul.f32 %v1788_v42, %v599_v35  ;;  %1801 = vrsqrt.f32 %v611_v21 }
 0x1ea   :  { %v634_v26 = vmul.f32 %v1790_v17, %v600_v50 }
 0x1eb   :  { %v639_v30 = vadd.f32 %v632_v22, %v616_v20 }
 0x1ec   :  { %v640_v39 = vadd.f32 %v634_v26, %v618_v25  ;;  %v1792_v48 = vpop.eup %1791 }
 0x1ed   :  { %v643_v40 = vmul.f32 0.5, %v639_v30  ;;  %v1794_v54 = vpop.eup %1793  ;;  %v620_v63 = vmul.f32 %v1792_v48, %v342_v60  ;;  %v603_v60 = vld [vmem:[%s2597_s6] sm:$0xff] }
 0x1ee   :  { %v644_v51 = vmul.f32 0.5, %v640_v39  ;;  %v622_v16 = vmul.f32 %v1794_v54, %v343_v3 }
 0x1ef   :  { %v647_v56 = vadd.f32 1e-05, %v643_v40 }
 0x1f0   :  { %v1796_v58 = vpop.eup %1795  ;;  %v648_v32 = vadd.f32 1e-05, %v644_v51 }
 0x1f1   :  { %v1798_v61 = vpop.eup %1797  ;;  %1803 = vrsqrt.f32 %v647_v56  ;;  %v636_v24 = vmul.f32 %v1796_v58, %v601_v45  ;;  %v605_v58 = vld [vmem:[%s2597_s6 + $0x10] sm:$0xff] }
 0x1f2   :  { %1805 = vrsqrt.f32 %v648_v32  ;;  %v638_v35 = vmul.f32 %v1798_v61, %v602_v43  ;;  %v1800_v46 = vpop.eup %1799 }
 0x1f3   :  { %v641_v19 = vadd.f32 %v636_v24, %v620_v63  ;;  %1807 = vrsqrt.f32 %v627_v52  ;;  %v1802_v21 = vpop.eup %1801  ;;  %v604_v52 = vld [vmem:[%s2597_s6 + $0x8] sm:$0xff] }
 0x1f4   :  { %v642_v50 = vadd.f32 %v638_v35, %v622_v16  ;;  %1809 = vrsqrt.f32 %v628_v55  ;;  %v610_v35 = vld [vmem:[%s2598_s7 + $0x18] sm:$0xff] }
 0x1f5   :  { %v645_v5 = vmul.f32 0.5, %v641_v19  ;;  %1811 = vrsqrt.f32 %v614_v8 }
 0x1f6   :  { %v646_v29 = vmul.f32 0.5, %v642_v50 }
 0x1f7   :  { %v649_v11 = vadd.f32 1e-05, %v645_v5 }
 0x1f8   :  { %v650_v23 = vadd.f32 1e-05, %v646_v29 }
 0x1f9   :  { %1813 = vrsqrt.f32 %v649_v11  ;;  %v607_v11 = vld [vmem:[%s2598_s7] sm:$0xff] }
 0x1fa   :  { %1815 = vrsqrt.f32 %v650_v23 }
 0x1fb   :  { %v1804_v47 = vpop.eup %1803  ;;  %1817 = vrsqrt.f32 %v613_v36 }
 0x1fc   :  { %v1806_v3 = vpop.eup %1805  ;;  %1819 = vrsqrt.f32 %v630_v15  ;;  %v659_v55 = vmul.f32 %v1804_v47, %v1802_v21  ;;  %v606_v15 = vld [vmem:[%s2597_s6 + $0x18] sm:$0xff]  ;;  %v608_v21 = vld [vmem:[%s2598_s7 + $0x8] sm:$0xff] }
 0x1fd   :  { %v660_v45 = vmul.f32 %v1806_v3, %v1800_v46  ;;  %v1808_v8 = vpop.eup %1807  ;;  %1821 = vrsqrt.f32 %v629_v13 }
 0x1fe   :  { %v663_v43 = vmul.f32 %v659_v55, %v603_v60  ;;  %v679_v17 = vmul.f32 %v1808_v8, %v1804_v47  ;;  %v1810_v20 = vpop.eup %1809 }
 0x1ff   :  { %v664_v42 = vmul.f32 %v660_v45, %v604_v52  ;;  %v1812_v36 = vpop.eup %1811  ;;  %v680_v26 = vmul.f32 %v1810_v20, %v1806_v3  ;;  %v609_v45 = vld [vmem:[%s2598_s7 + $0x10] sm:$0xff] }
 0x200   :  { %697 = vperm.xlu0 %1765, %v663_v43   ;;  %v683_v25 = vmul.f32 %v679_v17, %v603_v60  ;;  %v667_v29 = vmul.f32 %v663_v43, %v2258_v2  ;;  %v764_v2 = vld [vmem:[%s2600_s9 + $0x8] sm:$0xff]  ;;  %v766_v60 = vld [vmem:[%s2600_s9 + $0x18] sm:$0xff] }
 0x201   :  { %702 = vperm.xlu1 %1766, %v664_v42   ;;  %v684_v51 = vmul.f32 %v680_v26, %v604_v52  ;;  %v668_v46 = vmul.f32 %v664_v42, %v2260_v4 }
 0x202   :  { %v671_v23 = vsub.f32 %v607_v11, %v667_v29  ;;  %v687_v47 = vmul.f32 %v683_v25, %v2262_v33 }
 0x203   :  { %v1814_v22 = vpop.eup %1813  ;;  %v688_v3 = vmul.f32 %v684_v51, %v2266_v9  ;;  %v763_v9 = vld [vmem:[%s2600_s9] sm:$0xff] }
 0x204   :  { %v1816_v30 = vpop.eup %1815  ;;  %v691_v4 = vsub.f32 %v607_v11, %v687_v47 }
 0x205   :  { %v1818_v39 = vpop.eup %1817  ;;  %942 = vperm.xlu1 %1766, %v683_v25   ;;  %v662_v40 = vmul.f32 %v1816_v30, %v1812_v36  ;;  %v692_v52 = vsub.f32 %v608_v21, %v688_v3 }
 0x206   :  { %v1820_v48 = vpop.eup %1819  ;;  %v661_v13 = vmul.f32 %v1818_v39, %v1814_v22 }
 0x207   :  { %v666_v54 = vmul.f32 %v662_v40, %v606_v15  ;;  %v682_v56 = vmul.f32 %v1820_v48, %v1816_v30  ;;  %v1822_v32 = vpop.eup %1821 }
 0x208   :  { %v665_v63 = vmul.f32 %v661_v13, %v605_v58  ;;  %v681_v16 = vmul.f32 %v1822_v32, %v1814_v22 }
 0x209   :  { %947 = vperm.xlu1 %1766, %v684_v51   ;;  %712 = vperm.xlu0 %1765, %v666_v54   ;;  %v686_v61 = vmul.f32 %v682_v56, %v606_v15  ;;  %v670_v24 = vmul.f32 %v666_v54, %v2276_v18 }
 0x20a   :  { %v685_v50 = vmul.f32 %v681_v16, %v605_v58  ;;  %v669_v55 = vmul.f32 %v665_v63, %v2272_v41  ;;  %v765_v41 = vld [vmem:[%s2600_s9 + $0x10] sm:$0xff] }
 0x20b   :  { %v674_v19 = vsub.f32 %v610_v35, %v670_v24  ;;  %v690_v5 = vmul.f32 %v686_v61, %v2284_v49  ;;  %v672_v49 = vsub.f32 %v608_v21, %v668_v46 }
 0x20c   :  { %v673_v33 = vsub.f32 %v609_v45, %v669_v55  ;;  %v689_v8 = vmul.f32 %v685_v50, %v2280_v31 }
 0x20d   :  { %957 = vperm.xlu0 %1765, %v686_v61   ;;  %707 = vperm.xlu1 %1766, %v665_v63   ;;  %v694_v18 = vsub.f32 %v610_v35, %v690_v5 }
 0x20e   :  { %v693_v43 = vsub.f32 %v609_v45, %v689_v8 }
 0x211   :  { %740 = vperm.xlu0 %1765, %v674_v19   ;;  %952 = vperm.xlu1 %1766, %v685_v50  }
 0x215   :  { %985 = vperm.xlu0 %1765, %v694_v18   ;;  %725 = vperm.xlu1 %1766, %v671_v23  }
 0x219   :  { %774 = vperm.xlu0 %1765, %v764_v2   ;;  %730 = vperm.xlu1 %1766, %v672_v49  }
 0x21d   :  { %784 = vperm.xlu0 %1765, %v766_v60   ;;  %970 = vperm.xlu1 %1766, %v691_v4  }
 0x221   :  { %975 = vperm.xlu1 %1766, %v692_v52  }
 0x225   :  { %735 = vperm.xlu1 %1766, %v673_v33  }
 0x229   :  { %980 = vperm.xlu1 %1766, %v693_v43  }
 0x22d   :  { %769 = vperm.xlu1 %1766, %v763_v9  }
 0x231   :  { %779 = vperm.xlu1 %1766, %v765_v41  }
 0x27f   :  { %v698_v22 = vpop.permute.xlu0 %697 }
 0x280   :  { %v703_v42 = vpop.permute.xlu1 %702  ;;  %v715_v30 = vmul.f32 %v698_v22, %v2163_v44  ;;  %v716_v15 = vmul.f32 %v698_v22, %v2169_v57 }
 0x281   :  { %v717_v39 = vmul.f32 %v703_v42, %v2177_v62  ;;  %v718_v40 = vmul.f32 %v703_v42, %v2180_v34 }
 0x284   :  { %v943_v17 = vpop.permute.xlu1 %942 }
 0x285   :  { %v960_v35 = vmul.f32 %v943_v17, %v2166_v53  ;;  %v961_v44 = vmul.f32 %v943_v17, %v2172_v59 }
 0x288   :  { %v948_v20 = vpop.permute.xlu1 %947  ;;  %v713_v31 = vpop.permute.xlu0 %712 }
 0x289   :  { %v962_v34 = vmul.f32 %v948_v20, %v2185_v1  ;;  %v963_v50 = vmul.f32 %v948_v20, %v2188_v28  ;;  %v721_v11 = vmul.f32 %v713_v31, %v2191_v27  ;;  %v722_v18 = vmul.f32 %v713_v31, %v2204_v10 }
 0x28c   :  { %v708_v36 = vpop.permute.xlu1 %707  ;;  %v958_v54 = vpop.permute.xlu0 %957 }
 0x28d   :  { %v719_v59 = vmul.f32 %v708_v36, %v2194_v6  ;;  %v720_v21 = vmul.f32 %v708_v36, %v2199_v7  ;;  %v966_v4 = vmul.f32 %v958_v54, %v2217_v14  ;;  %v967_v27 = vmul.f32 %v958_v54, %v2220_v38 }
 0x290   :  { %v953_v25 = vpop.permute.xlu1 %952  ;;  %v741_v62 = vpop.permute.xlu0 %740 }
 0x291   :  { %v749_v2 = vadd.f32 %v741_v62, %v721_v11  ;;  %v750_v49 = vadd.f32 %v741_v62, %v722_v18  ;;  %v964_v6 = vmul.f32 %v953_v25, %v2209_v12  ;;  %v965_v7 = vmul.f32 %v953_v25, %v2212_v37  ;;  %v759_v12 = vld [vmem:[%s2599_s8] sm:$0xff] }
 0x293   :  { %v757_v8 = vmax.f32 %v749_v2, 0.0  ;;  %v758_v43 = vmax.f32 %v750_v49, 0.0 }
 0x294   :  { %v726_v26 = vpop.permute.xlu1 %725  ;;  %v986_v3 = vpop.permute.xlu0 %985 }
 0x295   :  { %v743_v48 = vadd.f32 %v726_v26, %v715_v30  ;;  %v744_v51 = vadd.f32 %v726_v26, %v716_v15  ;;  %v994_v9 = vadd.f32 %v986_v3, %v966_v4  ;;  %v995_v41 = vadd.f32 %v986_v3, %v967_v27 }
 0x297   :  { %v751_v32 = vmax.f32 %v743_v48, 0.0  ;;  %v752_v61 = vmax.f32 %v744_v51, 0.0  ;;  %v1002_v31 = vmax.f32 %v994_v9, 0.0  ;;  %v1003_v26 = vmax.f32 %v995_v41, 0.0  ;;  %v762_v48 = vld [vmem:[%s2599_s8 + $0x18] sm:$0xff] }
 0x298   :  { %v731_v56 = vpop.permute.xlu1 %730 }
 0x299   :  { %v745_v13 = vadd.f32 %v731_v56, %v717_v39  ;;  %v746_v58 = vadd.f32 %v731_v56, %v718_v40  ;;  %v760_v39 = vld [vmem:[%s2599_s8 + $0x8] sm:$0xff]  ;;  %v761_v40 = vld [vmem:[%s2599_s8 + $0x10] sm:$0xff] }
 0x29b   :  { %v753_v63 = vmax.f32 %v745_v13, 0.0  ;;  %v754_v24 = vmax.f32 %v746_v58, 0.0 }
 0x29c   :  { %v971_v16 = vpop.permute.xlu1 %970 }
 0x29d   :  { %v1724_v57 = vpack.c.bf16 %v753_v63, %v751_v32  ;;  %v1722_v19 = vpack.c.bf16 %v754_v24, %v752_v61  ;;  %v988_v5 = vadd.f32 %v971_v16, %v960_v35  ;;  %v989_v29 = vadd.f32 %v971_v16, %v961_v44 }
 0x29f   :  { %1723 = vmatprep.subr.bf16.mxu0 %v1722_v19  ;;  %v996_v1 = vmax.f32 %v988_v5, 0.0  ;;  %v997_v47 = vmax.f32 %v989_v29, 0.0 }
 0x2a0   :  { %v976_v23 = vpop.permute.xlu1 %975  ;;  %1725 = vmatpush1.bf16.msra.mxu0 %v1724_v57  ;;  %v775_v57 = vpop.permute.xlu0 %774 }
 0x2a1   :  { %v990_v46 = vadd.f32 %v976_v23, %v962_v34  ;;  %v991_v53 = vadd.f32 %v976_v23, %v963_v50 }
 0x2a3   :  { %v998_v28 = vmax.f32 %v990_v46, 0.0  ;;  %v999_v60 = vmax.f32 %v991_v53, 0.0 }
 0x2a4   :  { %v736_v10 = vpop.permute.xlu1 %735 }
 0x2a5   :  { %v1732_v52 = vpack.c.bf16 %v998_v28, %v996_v1  ;;  %v747_v55 = vadd.f32 %v736_v10, %v719_v59  ;;  %v748_v45 = vadd.f32 %v736_v10, %v720_v21  ;;  %v1730_v33 = vpack.c.bf16 %v999_v60, %v997_v47 }
 0x2a7   :  { %v755_v42 = vmax.f32 %v747_v55, 0.0  ;;  %v756_v17 = vmax.f32 %v748_v45, 0.0  ;;  %1731 = vmatprep.subr.bf16.mxu1 %v1730_v33 }
 0x2a8   :  { %1733 = vmatpush1.bf16.msra.mxu1 %v1732_v52  ;;  %v981_v14 = vpop.permute.xlu1 %980 }
 0x2a9   :  { %v1728_v38 = vpack.c.bf16 %v757_v8, %v755_v42  ;;  %v992_v20 = vadd.f32 %v981_v14, %v964_v6  ;;  %v993_v36 = vadd.f32 %v981_v14, %v965_v7  ;;  %v1726_v22 = vpack.c.bf16 %v758_v43, %v756_v17  ;;  %v785_v7 = vpop.permute.xlu0 %784 }
 0x2ab   :  { %v1000_v30 = vmax.f32 %v992_v20, 0.0  ;;  %v1001_v15 = vmax.f32 %v993_v36, 0.0  ;;  %1727 = vmatprep.subr.bf16.mxu0 %v1726_v22 }
 0x2ac   :  { %1729 = vmatpush1.bf16.msra.mxu0 %v1728_v38  ;;  %v770_v51 = vpop.permute.xlu1 %769 }
 0x2ad   :  { %v1736_v37 = vpack.c.bf16 %v1002_v31, %v1000_v30  ;;  %v1734_v25 = vpack.c.bf16 %v1003_v26, %v1001_v15 }
 0x2af   :  { %1674 = vmatmul.mubr.msk.f32.vlgmr.msra.gmra.mrb[2].mxu0 %vm103_vm0, %v759_v12  ;;  %1735 = vmatprep.subr.bf16.mxu1 %v1734_v25 }
 0x2b0   :  { %1737 = vmatpush1.bf16.msra.mxu1 %v1736_v37  ;;  %869 = vmatprep.mubr.f32.mxu0 %v1939_v0  ;;  %v780_v6 = vpop.permute.xlu1 %779 }
 0x2b3   :  { %1675 = vmatmul.mubr.msk.f32.gmra.mrb[4].mxu0 %vm103_vm0, %v760_v39  ;;  %1678 = vmatmul.mubr.msk.f32.vlgmr.msra.gmra.mrb[2].mxu1 %vm103_vm0, %v759_v12 }
 0x2b4   :  { %875 = vmatprep.mubr.f32.mxu0 %v1939_v0  ;;  %1074 = vmatprep.mubr.f32.mxu1 %v1939_v0 }
 0x2b7   :  { %1676 = vmatmul.mubr.msk.f32.gmra.mrb[6].mxu0 %vm103_vm0, %v761_v40  ;;  %1679 = vmatmul.mubr.msk.f32.gmra.mrb[4].mxu1 %vm103_vm0, %v760_v39 }
 0x2b8   :  { %881 = vmatprep.mubr.f32.mxu0 %v1939_v0  ;;  %1080 = vmatprep.mubr.f32.mxu1 %v1939_v0 }
 0x2bb   :  { %1677 = vmatmul.mubr.msk.f32.gmra.mrb[8].mxu0 %vm103_vm0, %v762_v48  ;;  %1680 = vmatmul.mubr.msk.f32.gmra.mrb[6].mxu1 %vm103_vm0, %v761_v40 }
 0x2bc   :  { %1086 = vmatprep.mubr.f32.mxu1 %v1939_v0  ;;  %1405 = vmatprep.mubr.f32.mxu0 %v1939_v0 }
 0x2bf   :  { %1681 = vmatmul.mubr.msk.f32.gmra.mrb[8].mxu1 %vm103_vm0, %v762_v48 }
 0x2c0   :  { %1606 = vmatprep.mubr.f32.mxu1 %v1939_v0 }
 0x382   :  { %v865_v54 = vpop.f32.mrb[2].mxu0 }
 0x383   :  { %v2378_v56 = vadd.f32 %v865_v54, %v770_v51  ;;  %v867_v13 = vpop.f32.mrb[3].mxu0 }
 0x384   :  { %v2380_v58 = vadd.f32 %v867_v13, %v770_v51 }
 0x385   :  { %v904_v19 = vmul.f32 %v2378_v56, %v2378_v56 }
 0x386   :  { %v871_v32 = vpop.f32.mrb[4].mxu0  ;;  %v1070_v61 = vpop.f32.mrb[2].mxu1  ;;  %v888_v63 = vadd.f32 %v2380_v58, %v2378_v56  ;;  %v905_v62 = vmul.f32 %v2380_v58, %v2380_v58 }
 0x387   :  { %v2384_v24 = vadd.f32 %v1070_v61, %v770_v51  ;;  %v873_v16 = vpop.f32.mrb[5].mxu0  ;;  %v1072_v35 = vpop.f32.mrb[3].mxu1  ;;  %v2392_v34 = vadd.f32 %v871_v32, %v775_v57 }
 0x388   :  { %v2386_v44 = vadd.f32 %v1072_v35, %v770_v51  ;;  %889 = vadd.xlane.f32.xlu1 %v888_v63  ;;  %v2394_v50 = vadd.f32 %v873_v16, %v775_v57  ;;  %v912_v59 = vadd.f32 %v905_v62, %v904_v19 }
 0x389   :  { %v1109_v21 = vmul.f32 %v2384_v24, %v2384_v24  ;;  %v906_v28 = vmul.f32 %v2392_v34, %v2392_v34 }
 0x38a   :  { %v877_v5 = vpop.f32.mrb[6].mxu0  ;;  %v1076_v29 = vpop.f32.mrb[4].mxu1  ;;  %v1093_v11 = vadd.f32 %v2386_v44, %v2384_v24  ;;  %v1110_v47 = vmul.f32 %v2386_v44, %v2386_v44  ;;  %v907_v60 = vmul.f32 %v2394_v50, %v2394_v50  ;;  %v891_v17 = vadd.f32 %v2394_v50, %v2392_v34 }
 0x38b   :  { %v2398_v18 = vadd.f32 %v1076_v29, %v775_v57  ;;  %v879_v23 = vpop.f32.mrb[7].mxu0  ;;  %v1078_v46 = vpop.f32.mrb[5].mxu1  ;;  %v2416_v8 = vadd.f32 %v877_v5, %v780_v6 }
 0x38c   :  { %v2400_v53 = vadd.f32 %v1078_v46, %v775_v57  ;;  %1094 = vadd.xlane.f32.xlu0 %v1093_v11  ;;  %v1117_v10 = vadd.f32 %v1110_v47, %v1109_v21  ;;  %v915_v52 = vadd.f32 %v907_v60, %v906_v28  ;;  %v2418_v43 = vadd.f32 %v879_v23, %v780_v6 }
 0x38d   :  { %v1111_v55 = vmul.f32 %v2398_v18, %v2398_v18  ;;  %v908_v26 = vmul.f32 %v2416_v8, %v2416_v8 }
 0x38e   :  { %v883_v2 = vpop.f32.mrb[8].mxu0  ;;  %v1082_v49 = vpop.f32.mrb[6].mxu1  ;;  %v1096_v1 = vadd.f32 %v2400_v53, %v2398_v18  ;;  %v1112_v45 = vmul.f32 %v2400_v53, %v2400_v53  ;;  %v894_v38 = vadd.f32 %v2418_v43, %v2416_v8  ;;  %v909_v30 = vmul.f32 %v2418_v43, %v2418_v43 }
 0x38f   :  { %v885_v4 = vpop.f32.mrb[9].mxu0  ;;  %v1084_v27 = vpop.f32.mrb[7].mxu1  ;;  %v2420_v9 = vadd.f32 %v883_v2, %v785_v7  ;;  %v2426_v14 = vadd.f32 %v1082_v49, %v780_v6 }
 0x390   :  { %913 = vadd.xlane.f32.xlu0 %v912_v59  ;;  %1097 = vadd.xlane.f32.xlu1 %v1096_v1  ;;  %v2422_v41 = vadd.f32 %v885_v4, %v785_v7  ;;  %v1120_v42 = vadd.f32 %v1112_v45, %v1111_v55  ;;  %v2430_v20 = vadd.f32 %v1084_v27, %v780_v6 }
 0x391   :  { %v910_v37 = vmul.f32 %v2420_v9, %v2420_v9  ;;  %v918_v39 = vadd.f32 %v909_v30, %v908_v26  ;;  %v1113_v40 = vmul.f32 %v2426_v14, %v2426_v14 }
 0x392   :  { %v1088_v3 = vpop.f32.mrb[8].mxu1  ;;  %v897_v31 = vadd.f32 %v2422_v41, %v2420_v9  ;;  %v1099_v15 = vadd.f32 %v2430_v20, %v2426_v14  ;;  %v911_v25 = vmul.f32 %v2422_v41, %v2422_v41  ;;  %v1114_v51 = vmul.f32 %v2430_v20, %v2430_v20 }
 0x393   :  { %v1090_v33 = vpop.f32.mrb[9].mxu1  ;;  %v2432_v36 = vadd.f32 %v1088_v3, %v785_v7 }
 0x394   :  { %1118 = vadd.xlane.f32.xlu0 %v1117_v10  ;;  %916 = vadd.xlane.f32.xlu1 %v915_v52  ;;  %v2434_v22 = vadd.f32 %v1090_v33, %v785_v7  ;;  %v921_v48 = vadd.f32 %v911_v25, %v910_v37  ;;  %v1123_v32 = vadd.f32 %v1114_v51, %v1113_v40 }
 0x395   :  { %v1115_v54 = vmul.f32 %v2432_v36, %v2432_v36 }
 0x396   :  { %v1102_v12 = vadd.f32 %v2434_v22, %v2432_v36  ;;  %v1116_v13 = vmul.f32 %v2434_v22, %v2434_v22 }
 0x398   :  { %1121 = vadd.xlane.f32.xlu1 %v1120_v42  ;;  %892 = vadd.xlane.f32.xlu0 %v891_v17  ;;  %v1126_v61 = vadd.f32 %v1116_v13, %v1115_v54 }
 0x39c   :  { %895 = vadd.xlane.f32.xlu0 %v894_v38  ;;  %898 = vadd.xlane.f32.xlu1 %v897_v31 }
 0x3a0   :  { %1100 = vadd.xlane.f32.xlu0 %v1099_v15  ;;  %1103 = vadd.xlane.f32.xlu1 %v1102_v12 }
 0x3a4   :  { %919 = vadd.xlane.f32.xlu0 %v918_v39  ;;  %922 = vadd.xlane.f32.xlu1 %v921_v48 }
 0x3a8   :  { %1124 = vadd.xlane.f32.xlu0 %v1123_v32  ;;  %1127 = vadd.xlane.f32.xlu1 %v1126_v61 }
 0x415   :  { %v890_v63 = vpop.xlane.xlu1 %889 }
 0x416   :  { %v2458_v35 = vmul.f32 0.00390625, %v890_v63 }
 0x418   :  { %v928_v62 = vmul.f32 %v2458_v35, %v2458_v35 }
 0x419   :  { %v1095_v16 = vpop.xlane.xlu0 %1094 }
 0x41a   :  { %v2462_v5 = vmul.f32 0.00390625, %v1095_v16 }
 0x41c   :  { %v1133_v59 = vmul.f32 %v2462_v5, %v2462_v5 }
 0x41d   :  { %v1098_v57 = vpop.xlane.xlu1 %1097  ;;  %v914_v19 = vpop.xlane.xlu0 %913 }
 0x41e   :  { %v924_v29 = vmul.f32 0.00390625, %v914_v19  ;;  %v2466_v21 = vmul.f32 0.00390625, %v1098_v57 }
 0x420   :  { %v932_v11 = vsub.f32 %v924_v29, %v928_v62  ;;  %v1134_v4 = vmul.f32 %v2466_v21, %v2466_v21 }
 0x421   :  { %v917_v23 = vpop.xlane.xlu1 %916  ;;  %v1119_v46 = vpop.xlane.xlu0 %1118 }
 0x422   :  { %v936_v2 = vmax.f32 %v932_v11, 0.0  ;;  %v1129_v49 = vmul.f32 0.00390625, %v1119_v46  ;;  %v925_v52 = vmul.f32 0.00390625, %v917_v23 }
 0x424   :  { %v1153_v1 = vadd.f32 1e-05, %v936_v2  ;;  %v1137_v47 = vsub.f32 %v1129_v49, %v1133_v59 }
 0x425   :  { %v1122_v28 = vpop.xlane.xlu1 %1121  ;;  %v893_v60 = vpop.xlane.xlu0 %892 }
 0x426   :  { %v1141_v27 = vmax.f32 %v1137_v47, 0.0  ;;  %v1130_v3 = vmul.f32 0.00390625, %v1122_v28  ;;  %v2470_v10 = vmul.f32 0.00390625, %v893_v60  ;;  %1823 = vrcp.f32 %v1153_v1 }
 0x428   :  { %v1169_v55 = vadd.f32 1e-05, %v1141_v27  ;;  %v1138_v45 = vsub.f32 %v1130_v3, %v1134_v4  ;;  %v929_v33 = vmul.f32 %v2470_v10, %v2470_v10 }
 0x429   :  { %v899_v6 = vpop.xlane.xlu1 %898  ;;  %v896_v7 = vpop.xlane.xlu0 %895 }
 0x42a   :  { %1825 = vrcp.f32 %v1169_v55  ;;  %v1142_v42 = vmax.f32 %v1138_v45, 0.0  ;;  %v933_v17 = vsub.f32 %v925_v52, %v929_v33  ;;  %v2474_v12 = vmul.f32 0.00390625, %v899_v6 }
 0x42b   :  { %v2476_v37 = vmul.f32 0.00390625, %v896_v7 }
 0x42c   :  { %v1170_v38 = vadd.f32 1e-05, %v1142_v42  ;;  %v937_v31 = vmax.f32 %v933_v17, 0.0  ;;  %v931_v54 = vmul.f32 %v2474_v12, %v2474_v12 }
 0x42d   :  { %v1104_v26 = vpop.xlane.xlu1 %1103  ;;  %v1101_v30 = vpop.xlane.xlu0 %1100  ;;  %v930_v13 = vmul.f32 %v2476_v37, %v2476_v37 }
 0x42e   :  { %1827 = vrcp.f32 %v1170_v38  ;;  %v1154_v15 = vadd.f32 1e-05, %v937_v31  ;;  %v2478_v25 = vmul.f32 0.00390625, %v1104_v26  ;;  %v2480_v39 = vmul.f32 0.00390625, %v1101_v30 }
 0x430   :  { %1829 = vrcp.f32 %v1154_v15  ;;  %v1824_v51 = vpop.eup %1823  ;;  %v1136_v29 = vmul.f32 %v2478_v25, %v2478_v25  ;;  %v1135_v11 = vmul.f32 %v2480_v39, %v2480_v39 }
 0x431   :  { %v923_v40 = vpop.xlane.xlu1 %922  ;;  %v920_v48 = vpop.xlane.xlu0 %919  ;;  %v1158_v19 = vmul.f32 %v1824_v51, %v936_v2  ;;  %1831 = vrsqrt.f32 %v1153_v1 }
 0x432   :  { %v927_v32 = vmul.f32 0.00390625, %v923_v40  ;;  %v926_v61 = vmul.f32 0.00390625, %v920_v48  ;;  %1833 = vrsqrt.f32 %v1169_v55  ;;  %v1145_v55 = vld [vmem:[%s2601_s10] sm:$0xff] }
 0x434   :  { %v1826_v63 = vpop.eup %1825  ;;  %v935_v16 = vsub.f32 %v927_v32, %v931_v54  ;;  %v934_v57 = vsub.f32 %v926_v61, %v930_v13 }
 0x435   :  { %v1174_v62 = vmul.f32 %v1826_v63, %v1141_v27  ;;  %v1128_v23 = vpop.xlane.xlu1 %1127  ;;  %v1125_v46 = vpop.xlane.xlu0 %1124 }
 0x436   :  { %v939_v59 = vmax.f32 %v935_v16, 0.0  ;;  %v938_v49 = vmax.f32 %v934_v57, 0.0  ;;  %v1132_v47 = vmul.f32 0.00390625, %v1128_v23  ;;  %v1131_v28 = vmul.f32 0.00390625, %v1125_v46 }
 0x437   :  { %v1181_v60 = vadd.f32 %v1174_v62, %v1158_v19 }
 0x438   :  { %v1828_v4 = vpop.eup %1827  ;;  %v1156_v3 = vadd.f32 1e-05, %v939_v59  ;;  %v1140_v52 = vsub.f32 %v1132_v47, %v1136_v29  ;;  %v1139_v45 = vsub.f32 %v1131_v28, %v1135_v11  ;;  %v1155_v27 = vadd.f32 1e-05, %v938_v49 }
 0x439   :  { %v1185_v33 = vmul.f32 0.5, %v1181_v60  ;;  %v1176_v26 = vmul.f32 %v1828_v4, %v1142_v42  ;;  %v1146_v4 = vld [vmem:[%s2601_s10 + $0x8] sm:$0xff] }
 0x43a   :  { %v1830_v2 = vpop.eup %1829  ;;  %v1144_v6 = vmax.f32 %v1140_v52, 0.0  ;;  %v1143_v7 = vmax.f32 %v1139_v45, 0.0  ;;  %1835 = vrcp.f32 %v1156_v3 }
 0x43b   :  { %v1189_v17 = vadd.f32 1e-05, %v1185_v33  ;;  %v1160_v30 = vmul.f32 %v1830_v2, %v937_v31  ;;  %v1832_v1 = vpop.eup %1831 }
 0x43c   :  { %v1172_v40 = vadd.f32 1e-05, %v1144_v6  ;;  %v1171_v51 = vadd.f32 1e-05, %v1143_v7  ;;  %v1834_v32 = vpop.eup %1833 }
 0x43d   :  { %1837 = vrsqrt.f32 %v1189_v17  ;;  %v1182_v48 = vadd.f32 %v1176_v26, %v1160_v30  ;;  %v1150_v30 = vld [vmem:[%s2602_s11 + $0x8] sm:$0xff] }
 0x43e   :  { %1839 = vrcp.f32 %v1155_v27 }
 0x43f   :  { %v1186_v54 = vmul.f32 0.5, %v1182_v48  ;;  %1841 = vrcp.f32 %v1172_v40 }
 0x440   :  { %1843 = vrsqrt.f32 %v1170_v38 }
 0x441   :  { %v1190_v13 = vadd.f32 1e-05, %v1186_v54  ;;  %1845 = vrcp.f32 %v1171_v51 }
 0x442   :  { %1847 = vrsqrt.f32 %v1154_v15 }
 0x443   :  { %1849 = vrsqrt.f32 %v1190_v13 }
 0x444   :  { %v1836_v61 = vpop.eup %1835  ;;  %1851 = vrsqrt.f32 %v1156_v3 }
 0x445   :  { %v1164_v62 = vmul.f32 %v1836_v61, %v939_v59  ;;  %1853 = vrsqrt.f32 %v1155_v27 }
 0x447   :  { %v1838_v63 = vpop.eup %1837 }
 0x448   :  { %v1840_v42 = vpop.eup %1839  ;;  %v1221_v31 = vmul.f32 %v1838_v63, %v1834_v32  ;;  %v1201_v16 = vmul.f32 %v1838_v63, %v1832_v1 }
 0x449   :  { %v1842_v57 = vpop.eup %1841  ;;  %v1162_v46 = vmul.f32 %v1840_v42, %v938_v49 }
 0x44a   :  { %v1844_v19 = vpop.eup %1843  ;;  %v1180_v29 = vmul.f32 %v1842_v57, %v1144_v6  ;;  %v1225_v38 = vmul.f32 %v1221_v31, %v1145_v55  ;;  %v1205_v11 = vmul.f32 %v1201_v16, %v1145_v55 }
 0x44b   :  { %v1846_v23 = vpop.eup %1845 }
 0x44c   :  { %v1848_v15 = vpop.eup %1847  ;;  %v1184_v47 = vadd.f32 %v1180_v29, %v1164_v62  ;;  %v1178_v28 = vmul.f32 %v1846_v23, %v1143_v7  ;;  %1440 = vperm.xlu1 %1766, %v1225_v38   ;;  %1239 = vperm.xlu0 %1765, %v1205_v11   ;;  %v1209_v59 = vmul.f32 %v1205_v11, %v2458_v35  ;;  %v1149_v7 = vld [vmem:[%s2602_s11] sm:$0xff]  ;;  %v1152_v11 = vld [vmem:[%s2602_s11 + $0x18] sm:$0xff] }
 0x44d   :  { %v1850_v60 = vpop.eup %1849  ;;  %v1229_v35 = vmul.f32 %v1225_v38, %v2462_v5 }
 0x44e   :  { %v1202_v52 = vmul.f32 %v1850_v60, %v1848_v15  ;;  %v1188_v45 = vmul.f32 0.5, %v1184_v47  ;;  %v1183_v33 = vadd.f32 %v1178_v28, %v1162_v46  ;;  %v1222_v2 = vmul.f32 %v1850_v60, %v1844_v19  ;;  %v1852_v61 = vpop.eup %1851  ;;  %v1151_v46 = vld [vmem:[%s2602_s11 + $0x10] sm:$0xff] }
 0x44f   :  { %v1213_v3 = vsub.f32 %v1149_v7, %v1209_v59  ;;  %v1233_v1 = vsub.f32 %v1149_v7, %v1229_v35 }
 0x450   :  { %v1206_v6 = vmul.f32 %v1202_v52, %v1146_v4  ;;  %v1192_v17 = vadd.f32 1e-05, %v1188_v45  ;;  %v1187_v26 = vmul.f32 0.5, %v1183_v33  ;;  %v1226_v49 = vmul.f32 %v1222_v2, %v1146_v4  ;;  %v1305_v45 = vld [vmem:[%s2604_s13] sm:$0xff] }
 0x452   :  { %v1210_v48 = vmul.f32 %v1206_v6, %v2470_v10  ;;  %1855 = vrsqrt.f32 %v1192_v17  ;;  %v1191_v54 = vadd.f32 1e-05, %v1187_v26  ;;  %1445 = vperm.xlu0 %1765, %v1226_v49   ;;  %1244 = vperm.xlu1 %1766, %v1206_v6   ;;  %v1230_v13 = vmul.f32 %v1226_v49, %v2466_v21  ;;  %v1854_v10 = vpop.eup %1853  ;;  %v1147_v21 = vld [vmem:[%s2601_s10 + $0x10] sm:$0xff] }
 0x453   :  { %1857 = vrsqrt.f32 %v1172_v40  ;;  %v1148_v40 = vld [vmem:[%s2601_s10 + $0x18] sm:$0xff] }
 0x454   :  { %1859 = vrsqrt.f32 %v1191_v54  ;;  %v1214_v27 = vsub.f32 %v1150_v30, %v1210_v48  ;;  %v1234_v32 = vsub.f32 %v1150_v30, %v1230_v13 }
 0x455   :  { %1861 = vrsqrt.f32 %v1171_v51 }
 0x456   :  { %1267 = vperm.xlu1 %1766, %v1213_v3   ;;  %1272 = vperm.xlu0 %1765, %v1214_v27  }
 0x45a   :  { %1468 = vperm.xlu1 %1766, %v1233_v1   ;;  %1473 = vperm.xlu0 %1765, %v1234_v32  }
 0x45c   :  { %v1856_v63 = vpop.eup %1855 }
 0x45d   :  { %v1858_v5 = vpop.eup %1857  ;;  %v1204_v55 = vmul.f32 %v1856_v63, %v1852_v61 }
 0x45e   :  { %v1860_v42 = vpop.eup %1859  ;;  %v1224_v16 = vmul.f32 %v1858_v5, %v1856_v63 }
 0x45f   :  { %v1208_v51 = vmul.f32 %v1204_v55, %v1148_v40  ;;  %v1203_v31 = vmul.f32 %v1860_v42, %v1854_v10  ;;  %v1862_v57 = vpop.eup %1861 }
 0x460   :  { %v1223_v62 = vmul.f32 %v1862_v57, %v1860_v42  ;;  %v1228_v29 = vmul.f32 %v1224_v16, %v1148_v40 }
 0x461   :  { %1254 = vperm.xlu0 %1765, %v1208_v51   ;;  %v1207_v19 = vmul.f32 %v1203_v31, %v1147_v21  ;;  %v1212_v38 = vmul.f32 %v1208_v51, %v2474_v12 }
 0x462   :  { %v1227_v23 = vmul.f32 %v1223_v62, %v1147_v21  ;;  %v1232_v28 = vmul.f32 %v1228_v29, %v2478_v25  ;;  %v1308_v25 = vld [vmem:[%s2604_s13 + $0x18] sm:$0xff] }
 0x463   :  { %1249 = vperm.xlu1 %1766, %v1207_v19   ;;  %v1211_v15 = vmul.f32 %v1207_v19, %v2476_v37  ;;  %v1216_v47 = vsub.f32 %v1152_v11, %v1212_v38  ;;  %v1306_v37 = vld [vmem:[%s2604_s13 + $0x8] sm:$0xff] }
 0x464   :  { %v1231_v12 = vmul.f32 %v1227_v23, %v2480_v39  ;;  %v1236_v4 = vsub.f32 %v1152_v11, %v1232_v28  ;;  %v1307_v39 = vld [vmem:[%s2604_s13 + $0x10] sm:$0xff] }
 0x465   :  { %1455 = vperm.xlu0 %1765, %v1228_v29   ;;  %v1215_v60 = vsub.f32 %v1151_v46, %v1211_v15 }
 0x466   :  { %v1235_v52 = vsub.f32 %v1151_v46, %v1231_v12 }
 0x467   :  { %1450 = vperm.xlu1 %1766, %v1227_v23  }
 0x469   :  { %1282 = vperm.xlu0 %1765, %v1216_v47  }
 0x46b   :  { %1277 = vperm.xlu1 %1766, %v1215_v60  }
 0x46d   :  { %1483 = vperm.xlu0 %1765, %v1236_v4  }
 0x46f   :  { %1478 = vperm.xlu1 %1766, %v1235_v52  }
 0x471   :  { %1316 = vperm.xlu0 %1765, %v1306_v37  }
 0x473   :  { %1311 = vperm.xlu1 %1766, %v1305_v45  }
 0x475   :  { %1326 = vperm.xlu0 %1765, %v1308_v25  }
 0x477   :  { %1321 = vperm.xlu1 %1766, %v1307_v39  }
 0x479   :  { %1517 = vperm.xlu0 %1765, %v1306_v37  }
 0x47b   :  { %1512 = vperm.xlu1 %1766, %v1305_v45  }
 0x47d   :  { %1527 = vperm.xlu0 %1765, %v1308_v25  }
 0x47f   :  { %1522 = vperm.xlu1 %1766, %v1307_v39  }
 0x4cb   :  { %v1441_v33 = vpop.permute.xlu1 %1440  ;;  %v1240_v2 = vpop.permute.xlu0 %1239 }
 0x4cc   :  { %v1257_v17 = vmul.f32 %v1240_v2, %v2378_v56  ;;  %v1258_v26 = vmul.f32 %v1240_v2, %v2380_v58  ;;  %v1458_v13 = vmul.f32 %v1441_v33, %v2384_v24  ;;  %v1459_v1 = vmul.f32 %v1441_v33, %v2386_v44 }
 0x4d1   :  { %v1245_v59 = vpop.permute.xlu1 %1244  ;;  %v1446_v6 = vpop.permute.xlu0 %1445 }
 0x4d2   :  { %v1259_v49 = vmul.f32 %v1245_v59, %v2392_v34  ;;  %v1260_v7 = vmul.f32 %v1245_v59, %v2394_v50  ;;  %v1460_v32 = vmul.f32 %v1446_v6, %v2398_v18  ;;  %v1461_v34 = vmul.f32 %v1446_v6, %v2400_v53 }
 0x4d5   :  { %v1268_v30 = vpop.permute.xlu1 %1267  ;;  %v1273_v48 = vpop.permute.xlu0 %1272 }
 0x4d6   :  { %v1285_v54 = vadd.f32 %v1268_v30, %v1257_v17  ;;  %v1286_v35 = vadd.f32 %v1268_v30, %v1258_v26  ;;  %v1287_v3 = vadd.f32 %v1273_v48, %v1259_v49  ;;  %v1288_v27 = vadd.f32 %v1273_v48, %v1260_v7 }
 0x4d8   :  { %v1293_v61 = vmax.f32 %v1285_v54, 0.0  ;;  %v1294_v56 = vmax.f32 %v1286_v35, 0.0  ;;  %v1295_v10 = vmax.f32 %v1287_v3, 0.0  ;;  %v1296_v58 = vmax.f32 %v1288_v27, 0.0  ;;  %v1302_v54 = vld [vmem:[%s2603_s12 + $0x8] sm:$0xff]  ;;  %v1303_v35 = vld [vmem:[%s2603_s12 + $0x10] sm:$0xff] }
 0x4d9   :  { %v1469_v63 = vpop.permute.xlu1 %1468  ;;  %v1474_v50 = vpop.permute.xlu0 %1473  ;;  %v1304_v3 = vld [vmem:[%s2603_s12 + $0x18] sm:$0xff] }
 0x4da   :  { %v1740_v40 = vpack.c.bf16 %v1295_v10, %v1293_v61  ;;  %v1486_v5 = vadd.f32 %v1469_v63, %v1458_v13  ;;  %v1487_v55 = vadd.f32 %v1469_v63, %v1459_v1  ;;  %v1488_v42 = vadd.f32 %v1474_v50, %v1460_v32 }
 0x4db   :  { %v1489_v21 = vadd.f32 %v1474_v50, %v1461_v34  ;;  %v1738_v51 = vpack.c.bf16 %v1296_v58, %v1294_v56 }
 0x4dc   :  { %v1494_v31 = vmax.f32 %v1486_v5, 0.0  ;;  %v1495_v24 = vmax.f32 %v1487_v55, 0.0  ;;  %v1496_v16 = vmax.f32 %v1488_v42, 0.0 }
 0x4dd   :  { %v1497_v44 = vmax.f32 %v1489_v21, 0.0  ;;  %1739 = vmatprep.subr.bf16.mxu0 %v1738_v51 }
 0x4de   :  { %v1748_v18 = vpack.c.bf16 %v1496_v16, %v1494_v31  ;;  %1741 = vmatpush1.bf16.msra.mxu0 %v1740_v40 }
 0x4df   :  { %v1746_v57 = vpack.c.bf16 %v1497_v44, %v1495_v24 }
 0x4e0   :  { %v1255_v19 = vpop.permute.xlu0 %1254 }
 0x4e1   :  { %1747 = vmatprep.subr.bf16.mxu1 %v1746_v57  ;;  %v1263_v38 = vmul.f32 %v1255_v19, %v2420_v9  ;;  %v1264_v11 = vmul.f32 %v1255_v19, %v2422_v41 }
 0x4e2   :  { %v1250_v62 = vpop.permute.xlu1 %1249  ;;  %1749 = vmatpush1.bf16.msra.mxu1 %v1748_v18 }
 0x4e3   :  { %v1261_v15 = vmul.f32 %v1250_v62, %v2416_v8  ;;  %v1262_v46 = vmul.f32 %v1250_v62, %v2418_v43 }
 0x4e4   :  { %v1456_v53 = vpop.permute.xlu0 %1455 }
 0x4e5   :  { %v1464_v60 = vmul.f32 %v1456_v53, %v2432_v36  ;;  %v1465_v4 = vmul.f32 %v1456_v53, %v2434_v22 }
 0x4e6   :  { %v1451_v29 = vpop.permute.xlu1 %1450 }
 0x4e7   :  { %v1462_v25 = vmul.f32 %v1451_v29, %v2426_v14  ;;  %v1463_v9 = vmul.f32 %v1451_v29, %v2430_v20  ;;  %v1301_v14 = vld [vmem:[%s2603_s12] sm:$0xff]  ;;  %s1941_s12 = smov [#allocation8]  }
 0x4e8   :  { %v1283_v23 = vpop.permute.xlu0 %1282  ;;  %s1645_s20 = sshll.u32 %s1941_s12, 4  ;;  %s1646_s20 = int_to_ptr.vmem [resolvable:$true] %s1645_s20 }
 0x4e9   :  { %v1291_v47 = vadd.f32 %v1283_v23, %v1263_v38  ;;  %v1292_v28 = vadd.f32 %v1283_v23, %v1264_v11  ;;  %s1907_s21 = scalar_lea.vmem %s1646_s20, 2048  ;;  %p1912_p3 = scmp.lt.s32.totalorder %s1646_s20, %s1646_s20 }
 0x4ea   :  { %v1278_v12 = vpop.permute.xlu1 %1277  ;;  %p1908_p2 = scmp.ne.s32.totalorder %s1646_s20, %s1907_s21  ;;  %p1913_p4 = scmp.lt.s32.totalorder %s1907_s21, %s1907_s21 }
 0x4eb   :  { %v1289_v52 = vadd.f32 %v1278_v12, %v1261_v15  ;;  %v1290_v37 = vadd.f32 %v1278_v12, %v1262_v46  ;;  %v1299_v45 = vmax.f32 %v1291_v47, 0.0  ;;  %v1300_v41 = vmax.f32 %v1292_v28, 0.0 }
 0x4ec   :  { %v1484_v39 = vpop.permute.xlu0 %1483  ;;  %p1914_p5 = por %p1913_p4, %p1912_p3 }
 0x4ed   :  { %v1297_v33 = vmax.f32 %v1289_v52, 0.0  ;;  %v1298_v8 = vmax.f32 %v1290_v37, 0.0  ;;  %v1492_v2 = vadd.f32 %v1484_v39, %v1464_v60  ;;  %v1493_v43 = vadd.f32 %v1484_v39, %v1465_v4 }
 0x4ee   :  { %v1479_v59 = vpop.permute.xlu1 %1478  ;;  %p1915_p6 = pnand %p1914_p5, %p1908_p2 }
 0x4ef   :  { %v1744_v6 = vpack.c.bf16 %v1299_v45, %v1297_v33  ;;  %v1490_v17 = vadd.f32 %v1479_v59, %v1462_v25  ;;  %v1491_v36 = vadd.f32 %v1479_v59, %v1463_v9  ;;  %v1500_v26 = vmax.f32 %v1492_v2, 0.0 }
 0x4f0   :  { %v1501_v49 = vmax.f32 %v1493_v43, 0.0  ;;  %v1742_v22 = vpack.c.bf16 %v1300_v41, %v1298_v8  ;;  %v1317_v13 = vpop.permute.xlu0 %1316 }
 0x4f1   :  { %v1498_v7 = vmax.f32 %v1490_v17, 0.0  ;;  %v1499_v30 = vmax.f32 %v1491_v36, 0.0 }
 0x4f2   :  { %1743 = vmatprep.subr.bf16.mxu0 %v1742_v22  ;;  %v1312_v27 = vpop.permute.xlu1 %1311 }
 0x4f3   :  { %v1752_v48 = vpack.c.bf16 %v1500_v26, %v1498_v7  ;;  %1745 = vmatpush1.bf16.msra.mxu0 %v1744_v6  ;;  %v1750_v20 = vpack.c.bf16 %v1501_v49, %v1499_v30 }
 0x4f4   :  { %v1327_v61 = vpop.permute.xlu0 %1326 }
 0x4f5   :  { %1751 = vmatprep.subr.bf16.mxu1 %v1750_v20 }
 0x4f6   :  { %1682 = vmatmul.mubr.msk.f32.vlgmr.msra.gmra.mrb[10].mxu0 %vm103_vm0, %v1301_v14  ;;  %1753 = vmatpush1.bf16.msra.mxu1 %v1752_v48  ;;  %v1322_v1 = vpop.permute.xlu1 %1321 }
 0x4f7   :  { %1411 = vmatprep.mubr.f32.mxu0 %v1939_v0 }
 0x4f8   :  { %v1518_v51 = vpop.permute.xlu0 %1517 }
 0x4f9   :  { %1686 = vmatmul.mubr.msk.f32.vlgmr.msra.gmra.mrb[10].mxu1 %vm103_vm0, %v1301_v14 }
 0x4fa   :  { %1683 = vmatmul.mubr.msk.f32.gmra.mrb[12].mxu0 %vm103_vm0, %v1302_v54  ;;  %1612 = vmatprep.mubr.f32.mxu1 %v1939_v0  ;;  %v1513_v34 = vpop.permute.xlu1 %1512 }
 0x4fb   :  { %1417 = vmatprep.mubr.f32.mxu0 %v1939_v0 }
 0x4fc   :  { %v1528_v60 = vpop.permute.xlu0 %1527 }
 0x4fd   :  { %1687 = vmatmul.mubr.msk.f32.gmra.mrb[12].mxu1 %vm103_vm0, %v1302_v54 }
 0x4fe   :  { %1684 = vmatmul.mubr.msk.f32.gmra.mrb[14].mxu0 %vm103_vm0, %v1303_v35  ;;  %1618 = vmatprep.mubr.f32.mxu1 %v1939_v0  ;;  %v1523_v53 = vpop.permute.xlu1 %1522 }
 0x4ff   :  { %1423 = vmatprep.mubr.f32.mxu0 %v1939_v0 }
 0x501   :  { %1688 = vmatmul.mubr.msk.f32.gmra.mrb[14].mxu1 %vm103_vm0, %v1303_v35 }
 0x502   :  { %1685 = vmatmul.mubr.msk.f32.gmra.mrb[16].mxu0 %vm103_vm0, %v1304_v3  ;;  %1624 = vmatprep.mubr.f32.mxu1 %v1939_v0 }
 0x505   :  { %1689 = vmatmul.mubr.msk.f32.gmra.mrb[16].mxu1 %vm103_vm0, %v1304_v3 }
 0x5c9   :  { %v1407_v32 = vpop.f32.mrb[10].mxu0 }
 0x5ca   :  { %v1408_v56 = vadd.f32 %v1407_v32, %v1312_v27  ;;  %v1409_v10 = vpop.f32.mrb[11].mxu0 }
 0x5cb   :  { %v1410_v58 = vadd.f32 %v1409_v10, %v1312_v27 }
 0x5cc   :  { %1430 = vst [vmem:[#allocation8] sm:$0xff] %v1408_v56  ;;  %v1608_v63 = vpop.f32.mrb[10].mxu1 }
 0x5cd   :  { %1431 = vst [vmem:[#allocation8 + $0x8] sm:$0xff] %v1410_v58  ;;  %v1413_v50 = vpop.f32.mrb[12].mxu0  ;;  %v1609_v40 = vadd.f32 %v1608_v63, %v1513_v34  ;;  %v1610_v5 = vpop.f32.mrb[11].mxu1 }
 0x5ce   :  { %v1414_v55 = vadd.f32 %v1413_v50, %v1317_v13  ;;  %v1415_v42 = vpop.f32.mrb[13].mxu0  ;;  %v1611_v0 = vadd.f32 %v1610_v5, %v1513_v34 }
 0x5cf   :  { %1632 = vst [vmem:[#allocation8 + $0x40] sm:$0xff] %v1609_v40  ;;  %v1416_v21 = vadd.f32 %v1415_v42, %v1317_v13 }
 0x5d0   :  { %1432 = vst [vmem:[#allocation8 + $0x10] sm:$0xff] %v1414_v55  ;;  %1633 = vst [vmem:[#allocation8 + $0x48] sm:$0xff] %v1611_v0  ;;  %v1614_v31 = vpop.f32.mrb[12].mxu1 }
 0x5d1   :  { %1433 = vst [vmem:[#allocation8 + $0x18] sm:$0xff] %v1416_v21  ;;  %v1419_v24 = vpop.f32.mrb[14].mxu0  ;;  %v1615_v16 = vadd.f32 %v1614_v31, %v1518_v51  ;;  %v1616_v44 = vpop.f32.mrb[13].mxu1 }
 0x5d2   :  { %v1420_v18 = vadd.f32 %v1419_v24, %v1322_v1  ;;  %v1421_v57 = vpop.f32.mrb[15].mxu0  ;;  %v1617_v19 = vadd.f32 %v1616_v44, %v1518_v51 }
 0x5d3   :  { %1634 = vst [vmem:[#allocation8 + $0x50] sm:$0xff] %v1615_v16  ;;  %v1422_v62 = vadd.f32 %v1421_v57, %v1322_v1 }
 0x5d4   :  { %1434 = vst [vmem:[#allocation8 + $0x20] sm:$0xff] %v1420_v18  ;;  %1635 = vst [vmem:[#allocation8 + $0x58] sm:$0xff] %v1617_v19  ;;  %v1620_v29 = vpop.f32.mrb[14].mxu1 }
 0x5d5   :  { %1435 = vst [vmem:[#allocation8 + $0x28] sm:$0xff] %v1422_v62  ;;  %v1425_v38 = vpop.f32.mrb[16].mxu0  ;;  %v1621_v11 = vadd.f32 %v1620_v29, %v1523_v53  ;;  %v1622_v23 = vpop.f32.mrb[15].mxu1 }
 0x5d6   :  { %v1426_v15 = vadd.f32 %v1425_v38, %v1327_v61  ;;  %v1427_v46 = vpop.f32.mrb[17].mxu0  ;;  %v1623_v47 = vadd.f32 %v1622_v23, %v1523_v53 }
 0x5d7   :  { %1636 = vst [vmem:[#allocation8 + $0x60] sm:$0xff] %v1621_v11  ;;  %v1428_v28 = vadd.f32 %v1427_v46, %v1327_v61 }
 0x5d8   :  { %1436 = vst [vmem:[#allocation8 + $0x30] sm:$0xff] %v1426_v15  ;;  %1637 = vst [vmem:[#allocation8 + $0x68] sm:$0xff] %v1623_v47  ;;  %v1626_v12 = vpop.f32.mrb[16].mxu1 }
 0x5d9   :  { %1437 = vst [vmem:[#allocation8 + $0x38] sm:$0xff] %v1428_v28  ;;  %v1627_v4 = vadd.f32 %v1626_v12, %v1528_v60  ;;  %v1628_v52 = vpop.f32.mrb[17].mxu1 }
 0x5da   :  { %v1629_v37 = vadd.f32 %v1628_v52, %v1528_v60 }
 0x5db   :  { %1638 = vst [vmem:[#allocation8 + $0x70] sm:$0xff] %v1627_v4 }
 0x5dc   :  { %1639 = vst [vmem:[#allocation8 + $0x78] sm:$0xff] %v1629_v37 }
 0x5dd   :  { %1918 = shalt.err (!%p1915_p6)
}
 0x5de   :  { %s1919_s0 = scalar_lea.hbm %s2605_s14, 2048 }
 0x5df   :  { %p1920_p7 = scmp.ne.s32.totalorder %s2605_s14, %s1919_s0  ;;  %p1923_p8 = scmp.lt.u32.totalorder %s1919_s0, %s2605_s14 }
 0x5e1   :  { %p1925_p9 = pnand %p1923_p8, %p1920_p7 }
 0x5e3   :  { %1928 = shalt.err (!%p1925_p9)
}
 0x5e4   :  { %1651 = dma.vmem_to_hbm [thread:$0]  %s1646_s20, 2048, %s2605_s14, [#allocation5], %s1936_s23, %s1936_s23, %s1937_s24  }
 0x5e5   :  { %1933 = dma.done.wait [#allocation5], 2048  }
 0x5e6   :  { %1934 = vsyncadd [#allocation5], 4294965248 }
 0x5e7   :  { %1655 = vsyncpa [#allocation4], 1 }
 0x5e8   :  { %1656 = vsyncpa [#allocation7], 1 }
 0x5e9   :  { %1657 = vsyncpa [#allocation5], 1 }

</bundles_post_ra>
